<compile_context>
chip_gen: v7x
topology: tpu7x:2x2x1
jax: 0.10.0
libtpu: 0.0.40
codegen_flags: <defaults>
</compile_context>

<pallas_src>
import functools

import jax
import jax.numpy as jnp
from jax.experimental import pallas as pl
from jax.experimental.pallas import tpu as pltpu


# ---------------- config (mirrors the PyTorch cfg) ----------------
class Cfg:
    d_m = 32          # model dim
    n_h = 4           # num heads
    d_h = 8           # head dim
    n_ctx = 8         # context length
    attn_dir = "causal"
    dtype = jnp.float32


NEG_BIG = -1e30  # finite "minus infinity" for additive masking (avoids NaN)


# ---------------- Pallas kernel ----------------
def _attn_kernel(x_ref, w_ref, wo_ref, pad_ref, o_ref, *,
                 scale, n_h, d_h, causal, b_blk, s):
    """One grid step = B_blk batch elements, all heads.

    x_ref   : (B_blk, S, D_pad)        padded activations
    w_ref   : (3, n_h, D_pad, d_h)     per-head Q/K/V input projections
    wo_ref  : (n_h, d_h, D_pad)        per-head rows of W_O^T (lane-padded)
    pad_ref : (B_blk, 1, S)            additive padding bias (0 / NEG_BIG)
    o_ref   : (B_blk, S, D_pad)        padded output
    """
    d_pad = x_ref.shape[2]

    # Fold the batch block into the sublane axis (free: lane axis unchanged).
    x_flat = x_ref[...].reshape(b_blk * s, d_pad)            # (B_blk*S, D_pad)

    # Per-batch additive bias built in-kernel (no HBM (B,S,S) bias stream).
    if causal:
        rows = jax.lax.broadcasted_iota(jnp.int32, (s, s), 0)
        cols = jax.lax.broadcasted_iota(jnp.int32, (s, s), 1)
        causal_bias = jnp.where(rows >= cols,
                                jnp.float32(0.0), jnp.float32(NEG_BIG))
        biases = [causal_bias + pad_ref[b] for b in range(b_blk)]   # (S, S)
    else:
        biases = [pad_ref[b] for b in range(b_blk)]                 # (1, S)

    outs = [None] * b_blk

    # Heads statically unrolled (n_h is tiny).  Per-head weights are indexed
    # on leading ref axes -> no lane slicing of activations.
    for h in range(n_h):
        q_f = jnp.dot(x_flat, w_ref[0, h], preferred_element_type=jnp.float32)
        k_f = jnp.dot(x_flat, w_ref[1, h], preferred_element_type=jnp.float32)
        v_f = jnp.dot(x_flat, w_ref[2, h], preferred_element_type=jnp.float32)
        wo_h = wo_ref[h]                                     # (d_h, D_pad)

        for b in range(b_blk):
            sl = slice(b * s, (b + 1) * s)                   # sublane-aligned
            q, k, v = q_f[sl], k_f[sl], v_f[sl]              # (S, d_h)

            scores = jnp.dot(q, k.T, preferred_element_type=jnp.float32)
            scores = scores * scale + biases[b]              # pad + causal

            m = jnp.max(scores, axis=-1, keepdims=True)
            e = jnp.exp(scores - m)
            p = e * pl.reciprocal(jnp.sum(e, axis=-1, keepdims=True),
                                  approx=True)

            pv = jnp.dot(p, v, preferred_element_type=jnp.float32)     # (S, d_h)
            contrib = jnp.dot(pv, wo_h,
                              preferred_element_type=jnp.float32)      # (S, D_pad)
            outs[b] = contrib if outs[b] is None else outs[b] + contrib

    # One full-lane-width (unmasked) store per batch element.
    for b in range(b_blk):
        o_ref[b] = outs[b].astype(o_ref.dtype)


# ---------------- wrapper ----------------
def attention_pallas(x, WQ, WK, WV, WO, attention_mask, cfg):
    """x: (B, S, d_m).
    WQ/WK/WV: (n_h*d_h, d_m) PyTorch nn.Linear layout (out, in).
    WO:       (d_m, n_h*d_h) PyTorch nn.Linear layout (out, in).
    attention_mask: (B, S) float, 1 = keep, 0 = mask (or None).
    Returns (B, S, d_m) float32."""
    B, S, d_m = x.shape
    n_h, d_h = cfg.n_h, cfg.d_h
    scale = 1.0 / (d_h ** 0.5)
    causal = cfg.attn_dir == "causal"
    f32 = jnp.float32

    # Lane-dense padding of the model dim (multiple of 128 lanes).
    D_pad = max(128, ((d_m + 127) // 128) * 128)

    x_p = jnp.pad(x.astype(f32), ((0, 0), (0, 0), (0, D_pad - d_m)))

    def per_head_in(W):
        # (H, d_m) torch layout -> (n_h, D_pad, d_h): head-major, rows padded.
        w = W.astype(f32).reshape(n_h, d_h, d_m)
        w = jnp.transpose(w, (0, 2, 1))                       # (n_h, d_m, d_h)
        return jnp.pad(w, ((0, 0), (0, D_pad - d_m), (0, 0)))

    wqkv = jnp.stack([per_head_in(WQ), per_head_in(WK), per_head_in(WV)],
                     axis=0)                                  # (3, n_h, D_pad, d_h)

    # Per-head rows of W_O^T, zero-padded on the output (lane) axis.
    wo = WO.astype(f32).T.reshape(n_h, d_h, d_m)              # (n_h, d_h, d_m)
    wo = jnp.pad(wo, ((0, 0), (0, 0), (0, D_pad - d_m)))      # (n_h, d_h, D_pad)

    # Tiny (B, 1, S) additive padding bias (0 keep / NEG_BIG masked).
    if attention_mask is not None:
        pad_bias = jnp.where(attention_mask == 0.0, NEG_BIG, 0.0).astype(f32)
    else:
        pad_bias = jnp.zeros((B, S), f32)
    pad_bias = pad_bias[:, None, :]                           # (B, 1, S)

    # Batch folding: keep exactly 2 parallel grid steps when B allows it
    # (feeds both v7x TensorCores; halves per-step overhead on v5e/v6e too).
    if B % 2 == 0 and B >= 4:
        B_blk = B // 2
    else:
        B_blk = 1
    grid = (B // B_blk,)

    kernel = functools.partial(_attn_kernel, scale=scale, n_h=n_h, d_h=d_h,
                               causal=causal, b_blk=B_blk, s=S)

    out = pl.pallas_call(
        kernel,
        out_shape=jax.ShapeDtypeStruct((B, S, D_pad), f32),
        grid_spec=pltpu.PrefetchScalarGridSpec(
            num_scalar_prefetch=0,
            grid=grid,
            in_specs=[
                pl.BlockSpec((B_blk, S, D_pad), lambda b: (b, 0, 0)),     # x
                pl.BlockSpec((3, n_h, D_pad, d_h), lambda b: (0, 0, 0, 0)),  # W_QKV
                pl.BlockSpec((n_h, d_h, D_pad), lambda b: (0, 0, 0)),     # W_O^T
                pl.BlockSpec((B_blk, 1, S), lambda b: (b, 0, 0)),         # pad bias
            ],
            out_specs=pl.BlockSpec((B_blk, S, D_pad), lambda b: (b, 0, 0)),
        ),
        compiler_params=pltpu.CompilerParams(
            dimension_semantics=("parallel",)),
    )(x_p, wqkv, wo, pad_bias)

    return out[:, :, :d_m]


# ---------------- plain-JAX reference (mirrors the PyTorch forward) ----------
def attention_ref(x, WQ, WK, WV, WO, attention_mask, cfg):
    B, S, _ = x.shape
    n_h, d_h = cfg.n_h, cfg.d_h
    scale = 1.0 / (d_h ** 0.5)

    def proj(W):
        y = x @ W.T                                              # (B, S, H)
        return y.reshape(B, S, n_h, d_h).transpose(0, 2, 1, 3)   # (B, h, S, d)

    q, k, v = proj(WQ), proj(WK), proj(WV)
    scores = jnp.einsum("bhsd,bhtd->bhst", q, k) * scale
    if attention_mask is not None:
        scores = jnp.where(attention_mask[:, None, None, :] == 0.0,
                           -jnp.inf, scores)
    if cfg.attn_dir == "causal":
        keep = jnp.tril(jnp.ones((S, S), jnp.float32))
        scores = jnp.where(keep[None, None] == 0.0, -jnp.inf, scores)
    p = jax.nn.softmax(scores, axis=-1)
    oh = jnp.einsum("bhst,bhtd->bhsd", p, v)
    oh = oh.transpose(0, 2, 1, 3).reshape(B, S, n_h * d_h)
    return oh @ WO.T


if __name__ == "__main__":
    cfg = Cfg()
    B, S = 2, cfg.n_ctx
    H = cfg.n_h * cfg.d_h

    key = jax.random.PRNGKey(0)
    kx, kq, kk, kv, ko = jax.random.split(key, 5)

    x = jax.random.normal(kx, (B, S, cfg.d_m), dtype=jnp.float32)

    # PyTorch nn.Linear weight layout: (out_features, in_features).
    WQ = jax.random.normal(kq, (H, cfg.d_m), jnp.float32) * 0.1
    WK = jax.random.normal(kk, (H, cfg.d_m), jnp.float32) * 0.1
    WV = jax.random.normal(kv, (H, cfg.d_m), jnp.float32) * 0.1
    WO = jax.random.normal(ko, (cfg.d_m, H), jnp.float32) * 0.1

    # padding mask 'b s' (keep everything except the last position of batch 1)
    attention_mask = jnp.ones((B, S), jnp.float32)
    attention_mask = attention_mask.at[1, S - 1].set(0.0)

    out = attention_pallas(x, WQ, WK, WV, WO, attention_mask, cfg)
    out = jax.block_until_ready(out)

    ref = attention_ref(x, WQ, WK, WV, WO, attention_mask, cfg)
    assert out.shape == ref.shape
    # NOTE: fully-masked query rows would give a uniform softmax here (finite
    # -1e30 bias) instead of the reference's NaN; not exercised by this test.
    assert jnp.allclose(out, ref, atol=2e-3, rtol=2e-3), "mismatch vs reference"

    print("KERNEL_OK")
</pallas_src>

<mosaic_0001>
module attributes {stable_mosaic.version = 11 : i64} {
  func.func @_attn_kernel(%arg0: i32, %arg1: memref<1x8x128xf32, #tpu.memory_space<vmem>>, %arg2: memref<3x4x128x8xf32, #tpu.memory_space<vmem>>, %arg3: memref<4x8x128xf32, #tpu.memory_space<vmem>>, %arg4: memref<1x1x8xf32, #tpu.memory_space<vmem>>, %arg5: memref<1x8x128xf32, #tpu.memory_space<vmem>>) attributes {dimension_semantics = [#tpu.dimension_semantics<parallel>], iteration_bounds = array<i64: 2>, scalar_prefetch = 0 : i64, scratch_operands = 0 : i64, tpu.core_type = #tpu.core_type<tc>, window_params = [{transform_indices = @transform_0, window_bounds = array<i64: 1, 8, 128>}, {pipeline_mode = #tpu.pipeline_mode<synchronous>, transform_indices = @transform_1, window_bounds = array<i64: 3, 4, 128, 8>}, {pipeline_mode = #tpu.pipeline_mode<synchronous>, transform_indices = @transform_2, window_bounds = array<i64: 4, 8, 128>}, {transform_indices = @transform_3, window_bounds = array<i64: 1, 1, 8>}, {transform_indices = @transform_4, window_bounds = array<i64: 1, 8, 128>}]} {
    %c0 = arith.constant 0 : index
    %c0_0 = arith.constant 0 : index
    %c0_1 = arith.constant 0 : index
    %0 = vector.load %arg1[%c0, %c0_0, %c0_1] : memref<1x8x128xf32, #tpu.memory_space<vmem>>, vector<1x8x128xf32>
    %1 = vector.shape_cast %0 : vector<1x8x128xf32> to vector<8x128xf32>
    %2 = tpu.iota {dimensions = array<i32: 0>} : vector<8x8xi32>
    %3 = tpu.iota {dimensions = array<i32: 1>} : vector<8x8xi32>
    %4 = arith.cmpi sge, %2, %3 : vector<8x8xi32>
    %cst = arith.constant 0.000000e+00 : f32
    %cst_2 = arith.constant -1.000000e+30 : f32
    %5 = vector.broadcast %cst : f32 to vector<8x8xf32>
    %6 = vector.broadcast %cst_2 : f32 to vector<8x8xf32>
    %7 = arith.select %4, %5, %6 : vector<8x8xi1>, vector<8x8xf32>
    %c0_3 = arith.constant 0 : index
    %c0_4 = arith.constant 0 : index
    %c0_5 = arith.constant 0 : index
    %8 = vector.load %arg4[%c0_3, %c0_4, %c0_5] : memref<1x1x8xf32, #tpu.memory_space<vmem>>, vector<1x1x8xf32>
    %9 = vector.shape_cast %8 : vector<1x1x8xf32> to vector<1x8xf32>
    %10 = vector.broadcast %9 : vector<1x8xf32> to vector<8x8xf32>
    %11 = arith.addf %7, %10 : vector<8x8xf32>
    %c0_6 = arith.constant 0 : index
    %c0_7 = arith.constant 0 : index
    %c0_8 = arith.constant 0 : index
    %c0_9 = arith.constant 0 : index
    %12 = vector.load %arg2[%c0_6, %c0_7, %c0_8, %c0_9] : memref<3x4x128x8xf32, #tpu.memory_space<vmem>>, vector<1x1x128x8xf32>
    %13 = vector.shape_cast %12 : vector<1x1x128x8xf32> to vector<128x8xf32>
    %cst_10 = arith.constant dense<0.000000e+00> : vector<8x8xf32>
    %14 = tpu.matmul %1, %13, %cst_10 {dimension_numbers = #tpu.dot_dimension_numbers<[1], [0], [0], [1], [0, 0, 1, 1], [], []>} : vector<8x128xf32>, vector<128x8xf32>, vector<8x8xf32> -> vector<8x8xf32>
    %c1 = arith.constant 1 : index
    %c0_11 = arith.constant 0 : index
    %c0_12 = arith.constant 0 : index
    %c0_13 = arith.constant 0 : index
    %15 = vector.load %arg2[%c1, %c0_11, %c0_12, %c0_13] : memref<3x4x128x8xf32, #tpu.memory_space<vmem>>, vector<1x1x128x8xf32>
    %16 = vector.shape_cast %15 : vector<1x1x128x8xf32> to vector<128x8xf32>
    %cst_14 = arith.constant dense<0.000000e+00> : vector<8x8xf32>
    %17 = tpu.matmul %1, %16, %cst_14 {dimension_numbers = #tpu.dot_dimension_numbers<[1], [0], [0], [1], [0, 0, 1, 1], [], []>} : vector<8x128xf32>, vector<128x8xf32>, vector<8x8xf32> -> vector<8x8xf32>
    %c2 = arith.constant 2 : index
    %c0_15 = arith.constant 0 : index
    %c0_16 = arith.constant 0 : index
    %c0_17 = arith.constant 0 : index
    %18 = vector.load %arg2[%c2, %c0_15, %c0_16, %c0_17] : memref<3x4x128x8xf32, #tpu.memory_space<vmem>>, vector<1x1x128x8xf32>
    %19 = vector.shape_cast %18 : vector<1x1x128x8xf32> to vector<128x8xf32>
    %cst_18 = arith.constant dense<0.000000e+00> : vector<8x8xf32>
    %20 = tpu.matmul %1, %19, %cst_18 {dimension_numbers = #tpu.dot_dimension_numbers<[1], [0], [0], [1], [0, 0, 1, 1], [], []>} : vector<8x128xf32>, vector<128x8xf32>, vector<8x8xf32> -> vector<8x8xf32>
    %c0_19 = arith.constant 0 : index
    %c0_20 = arith.constant 0 : index
    %c0_21 = arith.constant 0 : index
    %21 = vector.load %arg3[%c0_19, %c0_20, %c0_21] : memref<4x8x128xf32, #tpu.memory_space<vmem>>, vector<1x8x128xf32>
    %22 = vector.shape_cast %21 : vector<1x8x128xf32> to vector<8x128xf32>
    %23 = tpu.transpose %17, [1, 0] : vector<8x8xf32> -> vector<8x8xf32>
    %cst_22 = arith.constant dense<0.000000e+00> : vector<8x8xf32>
    %24 = tpu.matmul %14, %23, %cst_22 {dimension_numbers = #tpu.dot_dimension_numbers<[1], [0], [0], [1], [0, 0, 1, 1], [], []>} : vector<8x8xf32>, vector<8x8xf32>, vector<8x8xf32> -> vector<8x8xf32>
    %cst_23 = arith.constant 0.353553385 : f32
    %25 = vector.broadcast %cst_23 : f32 to vector<8x8xf32>
    %26 = arith.mulf %24, %25 : vector<8x8xf32>
    %27 = arith.addf %26, %11 : vector<8x8xf32>
    %cst_24 = arith.constant dense<0xFF800000> : vector<8xf32>
    %28 = vector.multi_reduction <maximumf>, %27, %cst_24 [1] : vector<8x8xf32> to vector<8xf32>
    %29 = vector.shape_cast %28 : vector<8xf32> to vector<8x1xf32>
    %30 = vector.broadcast %29 : vector<8x1xf32> to vector<8x8xf32>
    %31 = arith.subf %27, %30 : vector<8x8xf32>
    %32 = math.exp %31 : vector<8x8xf32>
    %cst_25 = arith.constant dense<0.000000e+00> : vector<8xf32>
    %33 = vector.multi_reduction <add>, %32, %cst_25 [1] : vector<8x8xf32> to vector<8xf32>
    %34 = vector.shape_cast %33 : vector<8xf32> to vector<8x1xf32>
    %35 = tpu.reciprocal %34 {approx = true} : vector<8x1xf32> -> vector<8x1xf32>
    %36 = vector.broadcast %35 : vector<8x1xf32> to vector<8x8xf32>
    %37 = arith.mulf %32, %36 : vector<8x8xf32>
    %cst_26 = arith.constant dense<0.000000e+00> : vector<8x8xf32>
    %38 = tpu.matmul %37, %20, %cst_26 {dimension_numbers = #tpu.dot_dimension_numbers<[1], [0], [0], [1], [0, 0, 1, 1], [], []>} : vector<8x8xf32>, vector<8x8xf32>, vector<8x8xf32> -> vector<8x8xf32>
    %cst_27 = arith.constant dense<0.000000e+00> : vector<8x128xf32>
    %39 = tpu.matmul %38, %22, %cst_27 {dimension_numbers = #tpu.dot_dimension_numbers<[1], [0], [0], [1], [0, 0, 1, 1], [], []>} : vector<8x8xf32>, vector<8x128xf32>, vector<8x128xf32> -> vector<8x128xf32>
    %c0_28 = arith.constant 0 : index
    %c1_29 = arith.constant 1 : index
    %c0_30 = arith.constant 0 : index
    %c0_31 = arith.constant 0 : index
    %40 = vector.load %arg2[%c0_28, %c1_29, %c0_30, %c0_31] : memref<3x4x128x8xf32, #tpu.memory_space<vmem>>, vector<1x1x128x8xf32>
    %41 = vector.shape_cast %40 : vector<1x1x128x8xf32> to vector<128x8xf32>
    %cst_32 = arith.constant dense<0.000000e+00> : vector<8x8xf32>
    %42 = tpu.matmul %1, %41, %cst_32 {dimension_numbers = #tpu.dot_dimension_numbers<[1], [0], [0], [1], [0, 0, 1, 1], [], []>} : vector<8x128xf32>, vector<128x8xf32>, vector<8x8xf32> -> vector<8x8xf32>
    %c1_33 = arith.constant 1 : index
    %c1_34 = arith.constant 1 : index
    %c0_35 = arith.constant 0 : index
    %c0_36 = arith.constant 0 : index
    %43 = vector.load %arg2[%c1_33, %c1_34, %c0_35, %c0_36] : memref<3x4x128x8xf32, #tpu.memory_space<vmem>>, vector<1x1x128x8xf32>
    %44 = vector.shape_cast %43 : vector<1x1x128x8xf32> to vector<128x8xf32>
    %cst_37 = arith.constant dense<0.000000e+00> : vector<8x8xf32>
    %45 = tpu.matmul %1, %44, %cst_37 {dimension_numbers = #tpu.dot_dimension_numbers<[1], [0], [0], [1], [0, 0, 1, 1], [], []>} : vector<8x128xf32>, vector<128x8xf32>, vector<8x8xf32> -> vector<8x8xf32>
    %c2_38 = arith.constant 2 : index
    %c1_39 = arith.constant 1 : index
    %c0_40 = arith.constant 0 : index
    %c0_41 = arith.constant 0 : index
    %46 = vector.load %arg2[%c2_38, %c1_39, %c0_40, %c0_41] : memref<3x4x128x8xf32, #tpu.memory_space<vmem>>, vector<1x1x128x8xf32>
    %47 = vector.shape_cast %46 : vector<1x1x128x8xf32> to vector<128x8xf32>
    %cst_42 = arith.constant dense<0.000000e+00> : vector<8x8xf32>
    %48 = tpu.matmul %1, %47, %cst_42 {dimension_numbers = #tpu.dot_dimension_numbers<[1], [0], [0], [1], [0, 0, 1, 1], [], []>} : vector<8x128xf32>, vector<128x8xf32>, vector<8x8xf32> -> vector<8x8xf32>
    %c1_43 = arith.constant 1 : index
    %c0_44 = arith.constant 0 : index
    %c0_45 = arith.constant 0 : index
    %49 = vector.load %arg3[%c1_43, %c0_44, %c0_45] : memref<4x8x128xf32, #tpu.memory_space<vmem>>, vector<1x8x128xf32>
    %50 = vector.shape_cast %49 : vector<1x8x128xf32> to vector<8x128xf32>
    %51 = tpu.transpose %45, [1, 0] : vector<8x8xf32> -> vector<8x8xf32>
    %cst_46 = arith.constant dense<0.000000e+00> : vector<8x8xf32>
    %52 = tpu.matmul %42, %51, %cst_46 {dimension_numbers = #tpu.dot_dimension_numbers<[1], [0], [0], [1], [0, 0, 1, 1], [], []>} : vector<8x8xf32>, vector<8x8xf32>, vector<8x8xf32> -> vector<8x8xf32>
    %cst_47 = arith.constant 0.353553385 : f32
    %53 = vector.broadcast %cst_47 : f32 to vector<8x8xf32>
    %54 = arith.mulf %52, %53 : vector<8x8xf32>
    %55 = arith.addf %54, %11 : vector<8x8xf32>
    %cst_48 = arith.constant dense<0xFF800000> : vector<8xf32>
    %56 = vector.multi_reduction <maximumf>, %55, %cst_48 [1] : vector<8x8xf32> to vector<8xf32>
    %57 = vector.shape_cast %56 : vector<8xf32> to vector<8x1xf32>
    %58 = vector.broadcast %57 : vector<8x1xf32> to vector<8x8xf32>
    %59 = arith.subf %55, %58 : vector<8x8xf32>
    %60 = math.exp %59 : vector<8x8xf32>
    %cst_49 = arith.constant dense<0.000000e+00> : vector<8xf32>
    %61 = vector.multi_reduction <add>, %60, %cst_49 [1] : vector<8x8xf32> to vector<8xf32>
    %62 = vector.shape_cast %61 : vector<8xf32> to vector<8x1xf32>
    %63 = tpu.reciprocal %62 {approx = true} : vector<8x1xf32> -> vector<8x1xf32>
    %64 = vector.broadcast %63 : vector<8x1xf32> to vector<8x8xf32>
    %65 = arith.mulf %60, %64 : vector<8x8xf32>
    %cst_50 = arith.constant dense<0.000000e+00> : vector<8x8xf32>
    %66 = tpu.matmul %65, %48, %cst_50 {dimension_numbers = #tpu.dot_dimension_numbers<[1], [0], [0], [1], [0, 0, 1, 1], [], []>} : vector<8x8xf32>, vector<8x8xf32>, vector<8x8xf32> -> vector<8x8xf32>
    %cst_51 = arith.constant dense<0.000000e+00> : vector<8x128xf32>
    %67 = tpu.matmul %66, %50, %cst_51 {dimension_numbers = #tpu.dot_dimension_numbers<[1], [0], [0], [1], [0, 0, 1, 1], [], []>} : vector<8x8xf32>, vector<8x128xf32>, vector<8x128xf32> -> vector<8x128xf32>
    %68 = arith.addf %39, %67 : vector<8x128xf32>
    %c0_52 = arith.constant 0 : index
    %c2_53 = arith.constant 2 : index
    %c0_54 = arith.constant 0 : index
    %c0_55 = arith.constant 0 : index
    %69 = vector.load %arg2[%c0_52, %c2_53, %c0_54, %c0_55] : memref<3x4x128x8xf32, #tpu.memory_space<vmem>>, vector<1x1x128x8xf32>
    %70 = vector.shape_cast %69 : vector<1x1x128x8xf32> to vector<128x8xf32>
    %cst_56 = arith.constant dense<0.000000e+00> : vector<8x8xf32>
    %71 = tpu.matmul %1, %70, %cst_56 {dimension_numbers = #tpu.dot_dimension_numbers<[1], [0], [0], [1], [0, 0, 1, 1], [], []>} : vector<8x128xf32>, vector<128x8xf32>, vector<8x8xf32> -> vector<8x8xf32>
    %c1_57 = arith.constant 1 : index
    %c2_58 = arith.constant 2 : index
    %c0_59 = arith.constant 0 : index
    %c0_60 = arith.constant 0 : index
    %72 = vector.load %arg2[%c1_57, %c2_58, %c0_59, %c0_60] : memref<3x4x128x8xf32, #tpu.memory_space<vmem>>, vector<1x1x128x8xf32>
    %73 = vector.shape_cast %72 : vector<1x1x128x8xf32> to vector<128x8xf32>
    %cst_61 = arith.constant dense<0.000000e+00> : vector<8x8xf32>
    %74 = tpu.matmul %1, %73, %cst_61 {dimension_numbers = #tpu.dot_dimension_numbers<[1], [0], [0], [1], [0, 0, 1, 1], [], []>} : vector<8x128xf32>, vector<128x8xf32>, vector<8x8xf32> -> vector<8x8xf32>
    %c2_62 = arith.constant 2 : index
    %c2_63 = arith.constant 2 : index
    %c0_64 = arith.constant 0 : index
    %c0_65 = arith.constant 0 : index
    %75 = vector.load %arg2[%c2_62, %c2_63, %c0_64, %c0_65] : memref<3x4x128x8xf32, #tpu.memory_space<vmem>>, vector<1x1x128x8xf32>
    %76 = vector.shape_cast %75 : vector<1x1x128x8xf32> to vector<128x8xf32>
    %cst_66 = arith.constant dense<0.000000e+00> : vector<8x8xf32>
    %77 = tpu.matmul %1, %76, %cst_66 {dimension_numbers = #tpu.dot_dimension_numbers<[1], [0], [0], [1], [0, 0, 1, 1], [], []>} : vector<8x128xf32>, vector<128x8xf32>, vector<8x8xf32> -> vector<8x8xf32>
    %c2_67 = arith.constant 2 : index
    %c0_68 = arith.constant 0 : index
    %c0_69 = arith.constant 0 : index
    %78 = vector.load %arg3[%c2_67, %c0_68, %c0_69] : memref<4x8x128xf32, #tpu.memory_space<vmem>>, vector<1x8x128xf32>
    %79 = vector.shape_cast %78 : vector<1x8x128xf32> to vector<8x128xf32>
    %80 = tpu.transpose %74, [1, 0] : vector<8x8xf32> -> vector<8x8xf32>
    %cst_70 = arith.constant dense<0.000000e+00> : vector<8x8xf32>
    %81 = tpu.matmul %71, %80, %cst_70 {dimension_numbers = #tpu.dot_dimension_numbers<[1], [0], [0], [1], [0, 0, 1, 1], [], []>} : vector<8x8xf32>, vector<8x8xf32>, vector<8x8xf32> -> vector<8x8xf32>
    %cst_71 = arith.constant 0.353553385 : f32
    %82 = vector.broadcast %cst_71 : f32 to vector<8x8xf32>
    %83 = arith.mulf %81, %82 : vector<8x8xf32>
    %84 = arith.addf %83, %11 : vector<8x8xf32>
    %cst_72 = arith.constant dense<0xFF800000> : vector<8xf32>
    %85 = vector.multi_reduction <maximumf>, %84, %cst_72 [1] : vector<8x8xf32> to vector<8xf32>
    %86 = vector.shape_cast %85 : vector<8xf32> to vector<8x1xf32>
    %87 = vector.broadcast %86 : vector<8x1xf32> to vector<8x8xf32>
    %88 = arith.subf %84, %87 : vector<8x8xf32>
    %89 = math.exp %88 : vector<8x8xf32>
    %cst_73 = arith.constant dense<0.000000e+00> : vector<8xf32>
    %90 = vector.multi_reduction <add>, %89, %cst_73 [1] : vector<8x8xf32> to vector<8xf32>
    %91 = vector.shape_cast %90 : vector<8xf32> to vector<8x1xf32>
    %92 = tpu.reciprocal %91 {approx = true} : vector<8x1xf32> -> vector<8x1xf32>
    %93 = vector.broadcast %92 : vector<8x1xf32> to vector<8x8xf32>
    %94 = arith.mulf %89, %93 : vector<8x8xf32>
    %cst_74 = arith.constant dense<0.000000e+00> : vector<8x8xf32>
    %95 = tpu.matmul %94, %77, %cst_74 {dimension_numbers = #tpu.dot_dimension_numbers<[1], [0], [0], [1], [0, 0, 1, 1], [], []>} : vector<8x8xf32>, vector<8x8xf32>, vector<8x8xf32> -> vector<8x8xf32>
    %cst_75 = arith.constant dense<0.000000e+00> : vector<8x128xf32>
    %96 = tpu.matmul %95, %79, %cst_75 {dimension_numbers = #tpu.dot_dimension_numbers<[1], [0], [0], [1], [0, 0, 1, 1], [], []>} : vector<8x8xf32>, vector<8x128xf32>, vector<8x128xf32> -> vector<8x128xf32>
    %97 = arith.addf %68, %96 : vector<8x128xf32>
    %c0_76 = arith.constant 0 : index
    %c3 = arith.constant 3 : index
    %c0_77 = arith.constant 0 : index
    %c0_78 = arith.constant 0 : index
    %98 = vector.load %arg2[%c0_76, %c3, %c0_77, %c0_78] : memref<3x4x128x8xf32, #tpu.memory_space<vmem>>, vector<1x1x128x8xf32>
    %99 = vector.shape_cast %98 : vector<1x1x128x8xf32> to vector<128x8xf32>
    %cst_79 = arith.constant dense<0.000000e+00> : vector<8x8xf32>
    %100 = tpu.matmul %1, %99, %cst_79 {dimension_numbers = #tpu.dot_dimension_numbers<[1], [0], [0], [1], [0, 0, 1, 1], [], []>} : vector<8x128xf32>, vector<128x8xf32>, vector<8x8xf32> -> vector<8x8xf32>
    %c1_80 = arith.constant 1 : index
    %c3_81 = arith.constant 3 : index
    %c0_82 = arith.constant 0 : index
    %c0_83 = arith.constant 0 : index
    %101 = vector.load %arg2[%c1_80, %c3_81, %c0_82, %c0_83] : memref<3x4x128x8xf32, #tpu.memory_space<vmem>>, vector<1x1x128x8xf32>
    %102 = vector.shape_cast %101 : vector<1x1x128x8xf32> to vector<128x8xf32>
    %cst_84 = arith.constant dense<0.000000e+00> : vector<8x8xf32>
    %103 = tpu.matmul %1, %102, %cst_84 {dimension_numbers = #tpu.dot_dimension_numbers<[1], [0], [0], [1], [0, 0, 1, 1], [], []>} : vector<8x128xf32>, vector<128x8xf32>, vector<8x8xf32> -> vector<8x8xf32>
    %c2_85 = arith.constant 2 : index
    %c3_86 = arith.constant 3 : index
    %c0_87 = arith.constant 0 : index
    %c0_88 = arith.constant 0 : index
    %104 = vector.load %arg2[%c2_85, %c3_86, %c0_87, %c0_88] : memref<3x4x128x8xf32, #tpu.memory_space<vmem>>, vector<1x1x128x8xf32>
    %105 = vector.shape_cast %104 : vector<1x1x128x8xf32> to vector<128x8xf32>
    %cst_89 = arith.constant dense<0.000000e+00> : vector<8x8xf32>
    %106 = tpu.matmul %1, %105, %cst_89 {dimension_numbers = #tpu.dot_dimension_numbers<[1], [0], [0], [1], [0, 0, 1, 1], [], []>} : vector<8x128xf32>, vector<128x8xf32>, vector<8x8xf32> -> vector<8x8xf32>
    %c3_90 = arith.constant 3 : index
    %c0_91 = arith.constant 0 : index
    %c0_92 = arith.constant 0 : index
    %107 = vector.load %arg3[%c3_90, %c0_91, %c0_92] : memref<4x8x128xf32, #tpu.memory_space<vmem>>, vector<1x8x128xf32>
    %108 = vector.shape_cast %107 : vector<1x8x128xf32> to vector<8x128xf32>
    %109 = tpu.transpose %103, [1, 0] : vector<8x8xf32> -> vector<8x8xf32>
    %cst_93 = arith.constant dense<0.000000e+00> : vector<8x8xf32>
    %110 = tpu.matmul %100, %109, %cst_93 {dimension_numbers = #tpu.dot_dimension_numbers<[1], [0], [0], [1], [0, 0, 1, 1], [], []>} : vector<8x8xf32>, vector<8x8xf32>, vector<8x8xf32> -> vector<8x8xf32>
    %cst_94 = arith.constant 0.353553385 : f32
    %111 = vector.broadcast %cst_94 : f32 to vector<8x8xf32>
    %112 = arith.mulf %110, %111 : vector<8x8xf32>
    %113 = arith.addf %112, %11 : vector<8x8xf32>
    %cst_95 = arith.constant dense<0xFF800000> : vector<8xf32>
    %114 = vector.multi_reduction <maximumf>, %113, %cst_95 [1] : vector<8x8xf32> to vector<8xf32>
    %115 = vector.shape_cast %114 : vector<8xf32> to vector<8x1xf32>
    %116 = vector.broadcast %115 : vector<8x1xf32> to vector<8x8xf32>
    %117 = arith.subf %113, %116 : vector<8x8xf32>
    %118 = math.exp %117 : vector<8x8xf32>
    %cst_96 = arith.constant dense<0.000000e+00> : vector<8xf32>
    %119 = vector.multi_reduction <add>, %118, %cst_96 [1] : vector<8x8xf32> to vector<8xf32>
    %120 = vector.shape_cast %119 : vector<8xf32> to vector<8x1xf32>
    %121 = tpu.reciprocal %120 {approx = true} : vector<8x1xf32> -> vector<8x1xf32>
    %122 = vector.broadcast %121 : vector<8x1xf32> to vector<8x8xf32>
    %123 = arith.mulf %118, %122 : vector<8x8xf32>
    %cst_97 = arith.constant dense<0.000000e+00> : vector<8x8xf32>
    %124 = tpu.matmul %123, %106, %cst_97 {dimension_numbers = #tpu.dot_dimension_numbers<[1], [0], [0], [1], [0, 0, 1, 1], [], []>} : vector<8x8xf32>, vector<8x8xf32>, vector<8x8xf32> -> vector<8x8xf32>
    %cst_98 = arith.constant dense<0.000000e+00> : vector<8x128xf32>
    %125 = tpu.matmul %124, %108, %cst_98 {dimension_numbers = #tpu.dot_dimension_numbers<[1], [0], [0], [1], [0, 0, 1, 1], [], []>} : vector<8x8xf32>, vector<8x128xf32>, vector<8x128xf32> -> vector<8x128xf32>
    %126 = arith.addf %97, %125 : vector<8x128xf32>
    %c0_99 = arith.constant 0 : index
    %c0_100 = arith.constant 0 : index
    %c0_101 = arith.constant 0 : index
    %127 = vector.load %arg5[%c0_99, %c0_100, %c0_101] : memref<1x8x128xf32, #tpu.memory_space<vmem>>, vector<1x8x128xf32>
    %128 = vector.shape_cast %127 : vector<1x8x128xf32> to vector<8x128xf32>
    %129 = vector.shape_cast %126 : vector<8x128xf32> to vector<1x8x128xf32>
    tpu.vector_store %arg5[%c0_99, %c0_100, %c0_101], %129 {strides = array<i32>} : memref<1x8x128xf32, #tpu.memory_space<vmem>>, vector<1x8x128xf32>,
    return
  }
  func.func @transform_0(%arg0: i32) -> (i32, i32, i32) {
    %c0_i32 = arith.constant 0 : i32
    %c0_i32_0 = arith.constant 0 : i32
    %c0_i32_1 = arith.constant 0 : i32
    return %arg0, %c0_i32, %c0_i32_0 : i32, i32, i32
  }
  func.func @transform_1(%arg0: i32) -> (i32, i32, i32, i32) {
    %c0_i32 = arith.constant 0 : i32
    %c0_i32_0 = arith.constant 0 : i32
    %c0_i32_1 = arith.constant 0 : i32
    %c0_i32_2 = arith.constant 0 : i32
    %c0_i32_3 = arith.constant 0 : i32
    return %c0_i32, %c0_i32_0, %c0_i32_1, %c0_i32_2 : i32, i32, i32, i32
  }
  func.func @transform_2(%arg0: i32) -> (i32, i32, i32) {
    %c0_i32 = arith.constant 0 : i32
    %c0_i32_0 = arith.constant 0 : i32
    %c0_i32_1 = arith.constant 0 : i32
    %c0_i32_2 = arith.constant 0 : i32
    return %c0_i32, %c0_i32_0, %c0_i32_1 : i32, i32, i32
  }
  func.func @transform_3(%arg0: i32) -> (i32, i32, i32) {
    %c0_i32 = arith.constant 0 : i32
    %c0_i32_0 = arith.constant 0 : i32
    %c0_i32_1 = arith.constant 0 : i32
    return %arg0, %c0_i32, %c0_i32_0 : i32, i32, i32
  }
  func.func @transform_4(%arg0: i32) -> (i32, i32, i32) {
    %c0_i32 = arith.constant 0 : i32
    %c0_i32_0 = arith.constant 0 : i32
    %c0_i32_1 = arith.constant 0 : i32
    return %arg0, %c0_i32, %c0_i32_0 : i32, i32, i32
  }
}

</mosaic_0001>

<bundles_post_ra>
// kernel: tpu_custom_call.1
= control target key start
LH: loop header
LB: loop body
LE: loop exit
PB: predicated region body
PF: predicated region fallthrough
CT: control target
= control target key end

     0   :  { %9 = vsyncpa [#allocation3], 0  ;;  %s4561_s0 = inlined_call_operand.vmem [shape: f32[2,8,128], index: 0, kind: input, shape index: {}]   ;;  %s4562_s1 = inlined_call_operand.vmem [shape: f32[3,4,128,8], index: 1, kind: input, shape index: {}]   ;;  %s4563_s2 = inlined_call_operand.vmem [shape: f32[4,8,128], index: 2, kind: input, shape index: {}]   ;;  %s4564_s3 = inlined_call_operand.vmem [shape: f32[2,1,8], index: 3, kind: input, shape index: {}]   ;;  %s4565_s4 = inlined_call_operand.hbm [shape: f32[2,8,128], index: 4, kind: output, shape index: {}]  }
   0x1   :  { %11 = vsyncpa [#allocation3 + $0x1], 0  ;;  %s3660_s15 = smov 0   ;;  %s3662_s16 = smov 0  }
   0x2   :  { %s3664_s17 = smov 0   ;;  %s3666_s18 = smov 0  }
   0x3 LB: > { %s3681_s19 = sadd.s32 4294967295, %s3628_s18   ;;  %s2298_s20 = sadd.s32 4294967294, %s3628_s18   ;;  %s3628_s18 = sphi %s3666_s18, %s4571_s18   ;;  %s3624_s17 = sphi %s3664_s17, %s4570_s17   ;;  %s3620_s16 = sphi %s3662_s16, %s4569_s16   ;;  %s3616_s15 = sphi %s3660_s15, %s4568_s15  }
   0x4   : > { %s3685_s21 = sadd.s32 1, %s3628_s18   ;;  %s118_s22 = sadd.s32 1, %s3624_s17 }
   0x5   : > { %s115_s23 = ssub.s32 %s3628_s18, %s3685_s21  ;;  %p128_p0 = scmp.ne.s32.totalorder %s3624_s17, %s3620_s16 }
   0x6   : > { %p116_p1 = scmp.eq.s32.totalorder %s115_s23, 0  ;;  %p129_p2 = scmp.eq.s32.totalorder %s3681_s19, 1 }
   0x7   : > { %p134_p3 = scmp.ne.s32.totalorder %s3620_s16, %s3616_s15  ;;  %p135_p4 = scmp.eq.s32.totalorder %s2298_s20, 1 }
   0x8   : > { %s3696_s24 = scalar_select %p116_p1, %s3624_s17, %s118_s22  }
   0x9   : > { %p3698_p5 = por %p129_p2, %p128_p0  ;;  %p3702_p6 = por %p135_p4, %p134_p3 }
   0xa   : > { %p2301_p7 = scmp.ge.s32.totalorder %s3628_s18, 1  ;;  %p172_p8 = scmp.lt.s32.totalorder %s3628_s18, 3 }
   0xc   : > { %p173_p9 = pnand %p2301_p7, %p172_p8 }
   0xd   : > { %v2305_v0 = vld [vmem:[%s4562_s1 + $0x200] sm:$0xff] (!%p173_p9)  ;;  %v2306_v1 = vld [vmem:[%s4562_s1 + $0x208] sm:$0xff] (!%p173_p9)  ;;  %v3630_v3 = vmov (!%p173_p9), 0.0|0.0   ;;  %v2307_v6 = vld [vmem:[%s4562_s1 + $0x210] sm:$0xff] (!%p173_p9)  ;;  %vm3631_vm0 = vmmov (!%p173_p9), 0   ;;  %v3632_v11 = vmov (!%p173_p9), 0.0  }
   0xe   : > { %176 = sbr.rel (%p173_p9) target bundleno = 3987 (0xf93), region = 36  ;;  %v222_v2 = vld [vmem:[%s4562_s1] sm:$0xff] (!%p173_p9)  ;;  %3236 = vmatprep.subr.bf16.mxu1 (!%p173_p9), %v3630_v3  ;;  %v3237_v4 = vpack.c.bf16 (!%p173_p9), %v2306_v1, %v2305_v0  ;;  %3212 = vmatprep.subr.bf16.mxu0 (!%p173_p9), %v3630_v3  ;;  %v223_v5 = vld [vmem:[%s4562_s1 + $0x8] sm:$0xff] (!%p173_p9)  ;;  %v2308_v7 = vld [vmem:[%s4562_s1 + $0x218] sm:$0xff] (!%p173_p9)  ;;  %p200_p10 = scmp.lt.s32.totalorder (!%p173_p9), %s3681_s19, 1  ;;  %vm483_vm1 = vcmask (!%p173_p9), 64512  }
   0xf   : > { %v3213_v8 = vpack.c.bf16 (!%p173_p9), %v223_v5, %v222_v2  ;;  %v224_v9 = vld [vmem:[%s4562_s1 + $0x10] sm:$0xff] (!%p173_p9)  ;;  %v225_v10 = vld [vmem:[%s4562_s1 + $0x18] sm:$0xff] (!%p173_p9)  ;;  %2799 = vmatprep.mubr.msk.f32.mxu1 (!%p173_p9), %vm3631_vm0, %v3632_v11  ;;  %2764 = vmatprep.mubr.msk.f32.mxu0 (!%p173_p9), %vm3631_vm0, %v3632_v11  ;;  %v3240_v12 = vpack.c.bf16 (!%p173_p9), %v2308_v7, %v2307_v6  ;;  %v2309_v14 = vld [vmem:[%s4562_s1 + $0x220] sm:$0xff] (!%p173_p9)  ;;  %s197_s14 = sand.u32 (!%p173_p9), 1, %s3620_s16   ;;  %s2501_s28 = sshll.u32 (!%p173_p9), %s3681_s19, 7 }
  0x10   : > { %3238 = vmatpush3.bf16.msra.mxu1 (!%p173_p9), %v3237_v4  ;;  %v3216_v13 = vpack.c.bf16 (!%p173_p9), %v225_v10, %v224_v9  ;;  %v2310_v15 = vld [vmem:[%s4562_s1 + $0x228] sm:$0xff] (!%p173_p9)  ;;  %v226_v16 = vld [vmem:[%s4562_s1 + $0x20] sm:$0xff] (!%p173_p9)  ;;  %v2311_v20 = vld [vmem:[%s4562_s1 + $0x230] sm:$0xff] (!%p173_p9)  ;;  %s4521_s5 = scalar_lea.hbm (!%p173_p9), %s4565_s4, %s2501_s28 }
  0x11   : > { %3214 = vmatpush3.bf16.msra.mxu0 (!%p173_p9), %v3213_v8  ;;  %3239 = vmatprep.subr.bf16.mxu1 (!%p173_p9), %v3630_v3  ;;  %v227_v17 = vld [vmem:[%s4562_s1 + $0x28] sm:$0xff] (!%p173_p9)  ;;  %v3243_v18 = vpack.c.bf16 (!%p173_p9), %v2310_v15, %v2309_v14  ;;  %v2312_v21 = vld [vmem:[%s4562_s1 + $0x238] sm:$0xff] (!%p173_p9)  ;;  %v228_v22 = vld [vmem:[%s4562_s1 + $0x30] sm:$0xff] (!%p173_p9) }
  0x12   : > { %3215 = vmatprep.subr.bf16.mxu0 (!%p173_p9), %v3630_v3  ;;  %v3219_v19 = vpack.c.bf16 (!%p173_p9), %v227_v17, %v226_v16  ;;  %v229_v23 = vld [vmem:[%s4562_s1 + $0x38] sm:$0xff] (!%p173_p9)  ;;  %v3246_v24 = vpack.c.bf16 (!%p173_p9), %v2312_v21, %v2311_v20  ;;  %v2313_v26 = vld [vmem:[%s4562_s1 + $0x240] sm:$0xff] (!%p173_p9)  ;;  %v2314_v27 = vld [vmem:[%s4562_s1 + $0x248] sm:$0xff] (!%p173_p9)  ;;  %v208_v17 = vlaneseq (!%p173_p9)  ;;  %v3633_v20 = vmov (!%p173_p9), -1e+30  }
  0x13   : > { %v3222_v25 = vpack.c.bf16 (!%p173_p9), %v229_v23, %v228_v22  ;;  %v230_v28 = vld [vmem:[%s4562_s1 + $0x40] sm:$0xff] (!%p173_p9)  ;;  %v231_v29 = vld [vmem:[%s4562_s1 + $0x48] sm:$0xff] (!%p173_p9)  ;;  %v3249_v30 = vpack.c.bf16 (!%p173_p9), %v2314_v27, %v2313_v26  ;;  %v2315_v32 = vld [vmem:[%s4562_s1 + $0x250] sm:$0xff] (!%p173_p9) }
  0x14   : > { %3241 = vmatpush3.bf16.msra.mxu1 (!%p173_p9), %v3240_v12  ;;  %v3225_v31 = vpack.c.bf16 (!%p173_p9), %v231_v29, %v230_v28  ;;  %v2316_v33 = vld [vmem:[%s4562_s1 + $0x258] sm:$0xff] (!%p173_p9)  ;;  %v232_v34 = vld [vmem:[%s4562_s1 + $0x50] sm:$0xff] (!%p173_p9)  ;;  %v2317_v38 = vld [vmem:[%s4562_s1 + $0x260] sm:$0xff] (!%p173_p9) }
  0x15   : > { %3217 = vmatpush3.bf16.msra.mxu0 %v3216_v13  ;;  %3242 = vmatprep.subr.bf16.mxu1 %v3630_v3  ;;  %v233_v35 = vld [vmem:[%s4562_s1 + $0x58] sm:$0xff]  ;;  %v3252_v36 = vpack.c.bf16 %v2316_v33, %v2315_v32  ;;  %v2318_v39 = vld [vmem:[%s4562_s1 + $0x268] sm:$0xff]  ;;  %v234_v40 = vld [vmem:[%s4562_s1 + $0x60] sm:$0xff]  ;;  %s3810_s6 = scalar_select %p200_p10, %s3681_s19, 1 }
  0x16   : > { %3218 = vmatprep.subr.bf16.mxu0 %v3630_v3  ;;  %v3228_v37 = vpack.c.bf16 %v233_v35, %v232_v34  ;;  %v235_v41 = vld [vmem:[%s4562_s1 + $0x68] sm:$0xff]  ;;  %v3255_v42 = vpack.c.bf16 %v2318_v39, %v2317_v38  ;;  %v2319_v44 = vld [vmem:[%s4562_s1 + $0x270] sm:$0xff]  ;;  %v2320_v45 = vld [vmem:[%s4562_s1 + $0x278] sm:$0xff]  ;;  %s3634_s19 = smov [#allocation2]  }
  0x17   : > { %v3231_v43 = vpack.c.bf16 %v235_v41, %v234_v40  ;;  %v236_v46 = vld [vmem:[%s4562_s1 + $0x70] sm:$0xff]  ;;  %v237_v47 = vld [vmem:[%s4562_s1 + $0x78] sm:$0xff]  ;;  %s2303_s20 = sshll.u32 %s3810_s6, 3  ;;  %v3258_v48 = vpack.c.bf16 %v2320_v45, %v2319_v44  ;;  %v2321_v55 = vld [vmem:[%s4562_s1 + $0x400] sm:$0xff]  ;;  %s206_s7 = scalar_lea.vmem %s4564_s3, %s3810_s6 }
  0x18   : > { %3244 = vmatpush3.bf16.msra.mxu1 %v3243_v18  ;;  %v3234_v49 = vpack.c.bf16 %v237_v47, %v236_v46  ;;  %s3831_s27 = scalar_lea.vmem %s4561_s0, %s2303_s20  ;;  %v2322_v56 = vld [vmem:[%s4562_s1 + $0x408] sm:$0xff]  ;;  %v2323_v57 = vld [vmem:[%s4562_s1 + $0x410] sm:$0xff]  ;;  %v2324_v59 = vld [vmem:[%s4562_s1 + $0x418] sm:$0xff]  ;;  %v209_v18 = vshrl.u32 %v208_v17, 7  ;;  %s2302_s20 = sshll.u32 %s197_s14, 3 }
  0x19   : > { %3220 = vmatpush3.bf16.msra.mxu0 %v3219_v19  ;;  %3245 = vmatprep.subr.bf16.mxu1 %v3630_v3  ;;  %v3835_v50 = vld [vmem:[%s3831_s27] sm:$0xff]  ;;  %v3261_v58 = vpack.c.bf16 %v2322_v56, %v2321_v55  ;;  %v3264_v60 = vpack.c.bf16 %v2324_v59, %v2323_v57  ;;  %v2326_v62 = vld [vmem:[%s4562_s1 + $0x428] sm:$0xff]  ;;  %v2327_v0 = vld [vmem:[%s4562_s1 + $0x430] sm:$0xff]  ;;  %v211_v19 = vand.u32 127, %v208_v17  ;;  %s199_s22 = scalar_lea.vmem [#allocation2], %s2302_s20  ;;  %s3570_s8 = sshll.u32 %s3634_s19, 4  ;;  %s3571_s8 = int_to_ptr.vmem [resolvable:$false] %s3570_s8 }
  0x1a   : > { %3221 = vmatprep.subr.bf16.mxu0 %v3630_v3  ;;  %v2325_v61 = vld [vmem:[%s4562_s1 + $0x420] sm:$0xff]  ;;  %v2328_v1 = vld [vmem:[%s4562_s1 + $0x438] sm:$0xff]  ;;  %v2330_v5 = vld [vmem:[%s4562_s1 + $0x448] sm:$0xff]  ;;  %s2230_s23 = sshll.u32 %s199_s22, 4  ;;  %s3572_s9 = scalar_lea.vmem %s3571_s8, 256  ;;  %s4516_s23 = int_to_ptr.vmem [resolvable:$true] %s2230_s23 }
  0x1b   : > { %v3267_v63 = vpack.c.bf16 %v2326_v62, %v2325_v61  ;;  %v3270_v2 = vpack.c.bf16 %v2328_v1, %v2327_v0  ;;  %v2329_v4 = vld [vmem:[%s4562_s1 + $0x440] sm:$0xff]  ;;  %v2331_v7 = vld [vmem:[%s4562_s1 + $0x450] sm:$0xff]  ;;  %v2332_v8 = vld [vmem:[%s4562_s1 + $0x458] sm:$0xff]  ;;  %vm212_vm2 = vcmp.ge.s32.totalorder %v209_v18, %v211_v19  ;;  %s3566_s6 = scalar_lea.vmem %s4516_s23, 128  ;;  %p3573_p0 = scmp.lt.s32.totalorder %s4516_s23, %s3571_s8 }
  0x1c   : > { %3247 = vmatpush3.bf16.msra.mxu1 %v3246_v24  ;;  %v3273_v6 = vpack.c.bf16 %v2330_v5, %v2329_v4  ;;  %v3276_v9 = vpack.c.bf16 %v2332_v8, %v2331_v7  ;;  %v2333_v10 = vld [vmem:[%s4562_s1 + $0x460] sm:$0xff]  ;;  %v2334_v12 = vld [vmem:[%s4562_s1 + $0x468] sm:$0xff]  ;;  %v2335_v14 = vld [vmem:[%s4562_s1 + $0x470] sm:$0xff]  ;;  %v213_v21 = vsel %vm212_vm2, 0.0, %v3633_v20  ;;  %p3567_p11 = scmp.ne.s32.totalorder %s4516_s23, %s3566_s6  ;;  %p3574_p1 = scmp.lt.s32.totalorder %s3572_s9, %s3566_s6 }
  0x1d   : > { %3223 = vmatpush3.bf16.msra.mxu0 %v3222_v25  ;;  %3248 = vmatprep.subr.bf16.mxu1 %v3630_v3  ;;  %v3279_v13 = vpack.c.bf16 %v2334_v12, %v2333_v10  ;;  %v2336_v15 = vld [vmem:[%s4562_s1 + $0x478] sm:$0xff]  ;;  %v2304_v22 = vld [vmem:[%s206_s7] ss:$0 sm:$0xff]  ;;  %v2357_v35 = vld [vmem:[%s4562_s1 + $0x288] sm:$0xff]  ;;  %s2217_s7 = scalar_lea.sflag [#allocation3], %s197_s14 }
  0x1e   : > { %3224 = vmatprep.subr.bf16.mxu0 %v3630_v3  ;;  %v3282_v16 = vpack.c.bf16 %v2336_v15, %v2335_v14  ;;  %v3913_v23 = vadd.f32 %v2304_v22, %v213_v21  ;;  %v2356_v34 = vld [vmem:[%s4562_s1 + $0x280] sm:$0xff]  ;;  %v2358_v39 = vld [vmem:[%s4562_s1 + $0x290] sm:$0xff]  ;;  %v2359_v40 = vld [vmem:[%s4562_s1 + $0x298] sm:$0xff]  ;;  %p3568_p12 = pnand %p3567_p11, %p3698_p5  ;;  %p3575_p2 = por %p3574_p1, %p3573_p0 }
  0x1f   : > { %v3312_v41 = vpack.c.bf16 %v2359_v40, %v2358_v39  ;;  %v2362_v45 = vld [vmem:[%s4562_s1 + $0x2b0] sm:$0xff]  ;;  %v2363_v46 = vld [vmem:[%s4562_s1 + $0x2b8] sm:$0xff]  ;;  %v2368_v55 = vld [vmem:[%s4562_s1 + $0x2e0] sm:$0xff] }
  0x20   : > { %3250 = vmatpush3.bf16.msra.mxu1 %v3249_v30  ;;  %v3318_v47 = vpack.c.bf16 %v2363_v46, %v2362_v45  ;;  %v2369_v56 = vld [vmem:[%s4562_s1 + $0x2e8] sm:$0xff]  ;;  %v2371_v59 = vld [vmem:[%s4562_s1 + $0x2f8] sm:$0xff]  ;;  %v2340_v62 = vld [vmem:[%s4562_s1 + $0x80] sm:$0xff]  ;;  %p3569_p13 = pneg %p3568_p12 }
  0x21   : > { %3226 = vmatpush3.bf16.msra.mxu0 %v3225_v31  ;;  %3251 = vmatprep.subr.bf16.mxu1 %v3630_v3  ;;  %v3327_v57 = vpack.c.bf16 %v2369_v56, %v2368_v55  ;;  %v2342_v4 = vld [vmem:[%s4562_s1 + $0x90] sm:$0xff]  ;;  %v2343_v5 = vld [vmem:[%s4562_s1 + $0x98] sm:$0xff]  ;;  %v2344_v7 = vld [vmem:[%s4562_s1 + $0xa0] sm:$0xff] }
  0x22   : > { %3227 = vmatprep.subr.bf16.mxu0 %v3630_v3  ;;  %v2345_v8 = vld [vmem:[%s4562_s1 + $0xa8] sm:$0xff]  ;;  %v2346_v10 = vld [vmem:[%s4562_s1 + $0xb0] sm:$0xff]  ;;  %v2347_v12 = vld [vmem:[%s4562_s1 + $0xb8] sm:$0xff]  ;;  %p3576_p3 = pnand %p3575_p2, %p3569_p13 }
  0x23   : > { %v2348_v14 = vld [vmem:[%s4562_s1 + $0xc0] sm:$0xff]  ;;  %v2349_v15 = vld [vmem:[%s4562_s1 + $0xc8] sm:$0xff]  ;;  %v2350_v17 = vld [vmem:[%s4562_s1 + $0xd0] sm:$0xff] }
  0x24   : > { %3253 = vmatpush3.bf16.msra.mxu1 %v3252_v36  ;;  %v3309_v36 = vpack.c.bf16 %v2357_v35, %v2356_v34  ;;  %v2351_v18 = vld [vmem:[%s4562_s1 + $0xd8] sm:$0xff]  ;;  %v2352_v20 = vld [vmem:[%s4562_s1 + $0xe0] sm:$0xff]  ;;  %v2353_v21 = vld [vmem:[%s4562_s1 + $0xe8] sm:$0xff] }
  0x25   : > { %3229 = vmatpush3.bf16.msra.mxu0 %v3228_v37  ;;  %3254 = vmatprep.subr.bf16.mxu1 %v3630_v3  ;;  %v3300_v19 = vpack.c.bf16 %v2351_v18, %v2350_v17  ;;  %v3303_v22 = vpack.c.bf16 %v2353_v21, %v2352_v20  ;;  %v2377_v34 = vld [vmem:[%s4562_s1 + $0x4a8] sm:$0xff]  ;;  %v2380_v39 = vld [vmem:[%s4562_s1 + $0x4c0] sm:$0xff]  ;;  %v2400_v21 = vld [vmem:[%s4562_s1 + $0x130] sm:$0xff] }
  0x26   : > { %3230 = vmatprep.subr.bf16.mxu0 %v3630_v3  ;;  %v2381_v40 = vld [vmem:[%s4562_s1 + $0x4c8] sm:$0xff]  ;;  %v2384_v45 = vld [vmem:[%s4562_s1 + $0x4e0] sm:$0xff] }
  0x27   : > { %v2385_v46 = vld [vmem:[%s4562_s1 + $0x4e8] sm:$0xff]  ;;  %v2398_v18 = vld [vmem:[%s4562_s1 + $0x120] sm:$0xff] }
  0x28   : > { %3256 = vmatpush3.bf16.msra.mxu1 %v3255_v42  ;;  %v2360_v42 = vld [vmem:[%s4562_s1 + $0x2a0] sm:$0xff] }
  0x29   : > { %3232 = vmatpush3.bf16.msra.mxu0 %v3231_v43  ;;  %3257 = vmatprep.subr.bf16.mxu1 %v3630_v3  ;;  %v2361_v43 = vld [vmem:[%s4562_s1 + $0x2a8] sm:$0xff] }
  0x2a   : > { %3233 = vmatprep.subr.bf16.mxu0 %v3630_v3  ;;  %v3315_v44 = vpack.c.bf16 %v2361_v43, %v2360_v42  ;;  %v2382_v42 = vld [vmem:[%s4562_s1 + $0x4d0] sm:$0xff]  ;;  %v2383_v43 = vld [vmem:[%s4562_s1 + $0x4d8] sm:$0xff] }
  0x2c   : > { %3259 = vmatpush3.bf16.msra.mxu1 %v3258_v48  ;;  %v2364_v48 = vld [vmem:[%s4562_s1 + $0x2c0] sm:$0xff] }
  0x2d   : > { %3235 = vmatpush3.bf16.msra.mxu0 %v3234_v49  ;;  %2837 = vmatprep.subr.mxu1 %v3632_v11  ;;  %v2365_v49 = vld [vmem:[%s4562_s1 + $0x2c8] sm:$0xff] }
  0x2e   : > { %3260 = vmatprep.subr.bf16.mxu0 %v3630_v3 }
  0x2f   : > { %2800 = vmatmul.mubr.f32.vlgmr.msra.gmra.mrb[0].mxu1 %v3835_v50 }
  0x30   : > { %2765 = vmatmul.mubr.f32.vlgmr.msra.gmra.mrb[0].mxu0 %v3835_v50  ;;  %2839 = vmatprep.mubr.msk.f32.mxu1 %vm3631_vm0, %v3632_v11 }
  0x31   : > { %2834 = vmatprep.mubr.msk.f32.mxu0 %vm3631_vm0, %v3632_v11  ;;  %3262 = vmatpush3.bf16.msra.mxu0 %v3261_v58  ;;  %v2370_v58 = vld [vmem:[%s4562_s1 + $0x2f0] sm:$0xff] }
  0x32   : > { %3263 = vmatprep.subr.bf16.mxu0 %v3630_v3 }
  0x35   : > { %3265 = vmatpush3.bf16.msra.mxu0 %v3264_v60  ;;  %v3330_v60 = vpack.c.bf16 %v2371_v59, %v2370_v58 }
  0x36   : > { %3266 = vmatprep.subr.bf16.mxu0 %v3630_v3 }
  0x39   : > { %3268 = vmatpush3.bf16.msra.mxu0 %v3267_v63  ;;  %v2341_v63 = vld [vmem:[%s4562_s1 + $0x88] sm:$0xff] }
  0x3a   : > { %3269 = vmatprep.subr.bf16.mxu0 %v3630_v3  ;;  %v3285_v1 = vpack.c.bf16 %v2341_v63, %v2340_v62 }
  0x3d   : > { %3271 = vmatpush3.bf16.msra.mxu0 %v3270_v2 }
  0x3e   : > { %3272 = vmatprep.subr.bf16.mxu0 %v3630_v3 }
  0x41   : > { %3274 = vmatpush3.bf16.msra.mxu0 %v3273_v6  ;;  %v3288_v6 = vpack.c.bf16 %v2343_v5, %v2342_v4 }
  0x42   : > { %3275 = vmatprep.subr.bf16.mxu0 %v3630_v3 }
  0x45   : > { %3277 = vmatpush3.bf16.msra.mxu0 %v3276_v9  ;;  %v3291_v9 = vpack.c.bf16 %v2345_v8, %v2344_v7  ;;  %v2388_v7 = vld [vmem:[%s4563_s2 + $0x8] sm:$0xff] }
  0x46   : > { %3278 = vmatprep.subr.bf16.mxu0 %v3630_v3 }
  0x49   : > { %3280 = vmatpush3.bf16.msra.mxu0 %v3279_v13  ;;  %v3294_v13 = vpack.c.bf16 %v2347_v12, %v2346_v10  ;;  %v2394_v12 = vld [vmem:[%s4562_s1 + $0x100] sm:$0xff] }
  0x4a   : > { %3281 = vmatprep.subr.bf16.mxu0 %v3630_v3 }
  0x4d   : > { %3283 = vmatpush3.bf16.msra.mxu0 %v3282_v16  ;;  %v3297_v16 = vpack.c.bf16 %v2349_v15, %v2348_v14  ;;  %v2396_v15 = vld [vmem:[%s4562_s1 + $0x110] sm:$0xff] }
  0x4e   : > { %3308 = vmatprep.subr.bf16.mxu0 %v3630_v3 }
  0x50   : > { %2835 = vmatmul.mubr.f32.vlgmr.msra.gmra.mrb[2].mxu0 %v3835_v50 }
  0x51   : > { %2914 = vmatprep.mubr.msk.f32.mxu0 %vm3631_vm0, %v3632_v11  ;;  %3310 = vmatpush3.bf16.msra.mxu0 %v3309_v36  ;;  %v2378_v36 = vld [vmem:[%s4562_s1 + $0x4b0] sm:$0xff] }
  0x52   : > { %3311 = vmatprep.subr.bf16.mxu0 %v3630_v3 }
  0x55   : > { %3313 = vmatpush3.bf16.msra.mxu0 %v3312_v41  ;;  %v3345_v41 = vpack.c.bf16 %v2381_v40, %v2380_v39  ;;  %v2410_v40 = vld [vmem:[%s4562_s1 + $0x300] sm:$0xff] }
  0x56   : > { %3314 = vmatprep.subr.bf16.mxu0 %v3630_v3 }
  0x59   : > { %3316 = vmatpush3.bf16.msra.mxu0 %v3315_v44  ;;  %v3348_v44 = vpack.c.bf16 %v2383_v43, %v2382_v42  ;;  %v2412_v43 = vld [vmem:[%s4562_s1 + $0x310] sm:$0xff] }
  0x5a   : > { %3317 = vmatprep.subr.bf16.mxu0 %v3630_v3 }
  0x5d   : > { %3319 = vmatpush3.bf16.msra.mxu0 %v3318_v47  ;;  %v3351_v47 = vpack.c.bf16 %v2385_v46, %v2384_v45  ;;  %v2414_v46 = vld [vmem:[%s4562_s1 + $0x320] sm:$0xff] }
  0x5e   : > { %3320 = vmatprep.subr.bf16.mxu0 %v3630_v3 }
 0x102   : > { %v391_v51 = vpop.f32.mrb[0].mxu1 }
 0x103   : > { %v2801_v52 = vpop.f32.mrb[1].mxu1  ;;  %2838 = vmatpush3.xpose.msk.msra.mxu1 %vm483_vm1, %v391_v51  ;;  %v304_v53 = vpop.f32.mrb[0].mxu0  ;;  %v3321_v51 = vpack.c.bf16 %v2365_v49, %v2364_v48  ;;  %v2386_v48 = vld [vmem:[%s4562_s1 + $0x4f0] sm:$0xff]  ;;  %v2387_v49 = vld [vmem:[%s4562_s1 + $0x4f8] sm:$0xff] }
 0x104   : > { %v2766_v54 = vpop.f32.mrb[1].mxu0  ;;  %2842 = vmatprep.subr.mxu1 %v3632_v11  ;;  %v2366_v52 = vld [vmem:[%s4562_s1 + $0x2d0] sm:$0xff] }
 0x105   : > { %3322 = vmatpush3.bf16.msra.mxu0 %v3321_v51  ;;  %v3354_v51 = vpack.c.bf16 %v2387_v49, %v2386_v48  ;;  %v2416_v49 = vld [vmem:[%s4562_s1 + $0x330] sm:$0xff] }
 0x106   : > { %2840 = vmatmul.mubr.msk.f32.vlgmr.msra.gmra.mrb[2].mxu1 %vm483_vm1, %v304_v53  ;;  %3323 = vmatprep.subr.bf16.mxu0 %v3630_v3  ;;  %v2367_v53 = vld [vmem:[%s4562_s1 + $0x2d8] sm:$0xff] }
 0x107   : > { %2844 = vmatprep.mubr.msk.f32.mxu1 %vm3631_vm0, %v3632_v11  ;;  %v3324_v54 = vpack.c.bf16 %v2367_v53, %v2366_v52 }
 0x109   : > { %3325 = vmatpush3.bf16.msra.mxu0 %v3324_v54 }
 0x10a   : > { %3326 = vmatprep.subr.bf16.mxu0 %v3630_v3 }
 0x10d   : > { %3328 = vmatpush3.bf16.msra.mxu0 %v3327_v57 }
 0x10e   : > { %3329 = vmatprep.subr.bf16.mxu0 %v3630_v3 }
 0x111   : > { %3331 = vmatpush3.bf16.msra.mxu0 %v3330_v60 }
 0x112   : > { %2962 = vmatprep.subr.mxu0 %v3632_v11 }
 0x114   : > { %2915 = vmatmul.mubr.f32.vlgmr.msra.gmra.mrb[4].mxu0 %v3835_v50 }
 0x115   : > { %2964 = vmatprep.mubr.msk.f32.mxu0 %vm3631_vm0, %v3632_v11  ;;  %2963 = vmatpush3.msra.mxu0 %v2388_v7  ;;  %v2427_v7 = vld [vmem:[%s4562_s1 + $0x508] sm:$0xff] }
 0x116   : > { %2967 = vmatprep.subr.mxu0 %v3632_v11 }
 0x123   : > { %v478_v37 = vpop.f32.mrb[2].mxu0 }
 0x124   : > { %v2836_v38 = vpop.f32.mrb[3].mxu0  ;;  %2843 = vmatpush3.msra.mxu1 %v478_v37  ;;  %v2379_v37 = vld [vmem:[%s4562_s1 + $0x4b8] sm:$0xff] }
 0x125   : > { %3284 = vmatprep.subr.bf16.mxu1 %v3630_v3  ;;  %v3342_v38 = vpack.c.bf16 %v2379_v37, %v2378_v36  ;;  %v482_v37 = vld [vmem:[%s4563_s2] sm:$0xff] }
 0x1d9   : > { %v556_v24 = vpop.f32.mrb[2].mxu1 }
 0x1da   : > { %v560_v25 = vmul.f32 0.35355338, %v556_v24  ;;  %v2841_v26 = vpop.f32.mrb[3].mxu1  ;;  %v2354_v24 = vld [vmem:[%s4562_s1 + $0xf0] sm:$0xff] }
 0x1dc   : > { %v561_v27 = vadd.f32 %v560_v25, %v3913_v23  ;;  %v2355_v25 = vld [vmem:[%s4562_s1 + $0xf8] sm:$0xff] }
 0x1dd   : > { %v3306_v26 = vpack.c.bf16 %v2355_v25, %v2354_v24  ;;  %v2402_v25 = vld [vmem:[%s4562_s1 + $0x140] sm:$0xff] }
 0x1de   : > { %v562_v28 = vsel %vm483_vm1, %v561_v27, -inf }
 0x1df   : > { %563 = vmax.xlane.f32.xlu0 %v562_v28  ;;  %v2373_v28 = vld [vmem:[%s4562_s1 + $0x488] sm:$0xff] }
 0x1e7   : > { %v816_v52 = vpop.f32.mrb[4].mxu0 }
 0x1e8   : > { %v2916_v53 = vpop.f32.mrb[5].mxu0 }
 0x1e9   : > { %v2418_v53 = vld [vmem:[%s4562_s1 + $0x340] sm:$0xff] }
 0x26c   : > { %v564_v29 = vpop.xlane.xlu0 %563 }
 0x26d   : > { %v565_v30 = vsub.f32 %v561_v27, %v564_v29  ;;  %v2372_v27 = vld [vmem:[%s4562_s1 + $0x480] sm:$0xff] }
 0x26e   : > { %v3333_v29 = vpack.c.bf16 %v2373_v28, %v2372_v27  ;;  %v2404_v28 = vld [vmem:[%s4562_s1 + $0x150] sm:$0xff] }
 0x26f   : > { %v566_v31 = vmul.f32 1.442695, %v565_v30  ;;  %v2374_v30 = vld [vmem:[%s4562_s1 + $0x490] sm:$0xff] }
 0x271   : > { %3549 = vpow2.f32 %v566_v31  ;;  %v2375_v31 = vld [vmem:[%s4562_s1 + $0x498] sm:$0xff] }
 0x27b   : > { %v3550_v32 = vpop.eup %3549 }
 0x27c   : > { %v568_v33 = vsel %vm483_vm1, %v3550_v32, 0.0 }
 0x27d   : > { %569 = vadd.xlane.f32.xlu0 %v568_v33  ;;  %v2376_v33 = vld [vmem:[%s4562_s1 + $0x4a0] sm:$0xff] }
 0x27e   : > { %v3339_v35 = vpack.c.bf16 %v2377_v34, %v2376_v33  ;;  %v2408_v34 = vld [vmem:[%s4562_s1 + $0x170] sm:$0xff] }
 0x30a   : > { %v570_v61 = vpop.xlane.xlu0 %569 }
 0x30b   : > { %3551 = vrcp.f32 %v570_v61 }
 0x315   : > { %v3552_v0 = vpop.eup %3551 }
 0x316   : > { %v572_v2 = vmul.f32 %v3552_v0, %v3550_v32  ;;  %v3336_v32 = vpack.c.bf16 %v2375_v31, %v2374_v30  ;;  %v2406_v31 = vld [vmem:[%s4562_s1 + $0x160] sm:$0xff] }
 0x318   : > { %2845 = vmatmul.mubr.msk.f32.vlgmr.msra.gmra.mrb[4].mxu1 %vm483_vm1, %v572_v2 }
 0x319   : > { %3286 = vmatpush3.bf16.msra.mxu1 %v3285_v1  ;;  %2879 = vmatprep.mubr.msk.f32.mxu1 %vm3631_vm0, %v3632_v11 }
 0x31a   : > { %3287 = vmatprep.subr.bf16.mxu1 %v3630_v3 }
 0x31d   : > { %3289 = vmatpush3.bf16.msra.mxu1 %v3288_v6 }
 0x31e   : > { %3290 = vmatprep.subr.bf16.mxu1 %v3630_v3 }
 0x321   : > { %3292 = vmatpush3.bf16.msra.mxu1 %v3291_v9 }
 0x322   : > { %3293 = vmatprep.subr.bf16.mxu1 %v3630_v3 }
 0x325   : > { %3295 = vmatpush3.bf16.msra.mxu1 %v3294_v13  ;;  %v2395_v13 = vld [vmem:[%s4562_s1 + $0x108] sm:$0xff] }
 0x326   : > { %3296 = vmatprep.subr.bf16.mxu1 %v3630_v3  ;;  %v3357_v14 = vpack.c.bf16 %v2395_v13, %v2394_v12  ;;  %v2430_v13 = vld [vmem:[%s4562_s1 + $0x520] sm:$0xff] }
 0x329   : > { %3298 = vmatpush3.bf16.msra.mxu1 %v3297_v16  ;;  %v2397_v16 = vld [vmem:[%s4562_s1 + $0x118] sm:$0xff] }
 0x32a   : > { %3299 = vmatprep.subr.bf16.mxu1 %v3630_v3  ;;  %v3360_v17 = vpack.c.bf16 %v2397_v16, %v2396_v15  ;;  %v2432_v16 = vld [vmem:[%s4562_s1 + $0x530] sm:$0xff] }
 0x32d   : > { %3301 = vmatpush3.bf16.msra.mxu1 %v3300_v19  ;;  %v2399_v19 = vld [vmem:[%s4562_s1 + $0x128] sm:$0xff] }
 0x32e   : > { %3302 = vmatprep.subr.bf16.mxu1 %v3630_v3  ;;  %v3363_v20 = vpack.c.bf16 %v2399_v19, %v2398_v18  ;;  %v2434_v19 = vld [vmem:[%s4562_s1 + $0x540] sm:$0xff] }
 0x331   : > { %3304 = vmatpush3.bf16.msra.mxu1 %v3303_v22  ;;  %v2401_v22 = vld [vmem:[%s4562_s1 + $0x138] sm:$0xff] }
 0x332   : > { %3305 = vmatprep.subr.bf16.mxu1 %v3630_v3  ;;  %v3366_v24 = vpack.c.bf16 %v2401_v22, %v2400_v21  ;;  %v2436_v22 = vld [vmem:[%s4562_s1 + $0x550] sm:$0xff] }
 0x335   : > { %3307 = vmatpush3.bf16.msra.mxu1 %v3306_v26  ;;  %v2403_v26 = vld [vmem:[%s4562_s1 + $0x148] sm:$0xff] }
 0x336   : > { %3332 = vmatprep.subr.bf16.mxu1 %v3630_v3  ;;  %v3369_v27 = vpack.c.bf16 %v2403_v26, %v2402_v25  ;;  %v2438_v26 = vld [vmem:[%s4562_s1 + $0x560] sm:$0xff] }
 0x338   : > { %2880 = vmatmul.mubr.f32.vlgmr.msra.gmra.mrb[6].mxu1 %v3835_v50 }
 0x339   : > { %3334 = vmatpush3.bf16.msra.mxu1 %v3333_v29  ;;  %2949 = vmatprep.mubr.msk.f32.mxu1 %vm3631_vm0, %v3632_v11  ;;  %v2405_v29 = vld [vmem:[%s4562_s1 + $0x158] sm:$0xff] }
 0x33a   : > { %3335 = vmatprep.subr.bf16.mxu1 %v3630_v3  ;;  %v3372_v30 = vpack.c.bf16 %v2405_v29, %v2404_v28  ;;  %v2440_v29 = vld [vmem:[%s4562_s1 + $0x570] sm:$0xff] }
 0x33d   : > { %3337 = vmatpush3.bf16.msra.mxu1 %v3336_v32  ;;  %v2407_v32 = vld [vmem:[%s4562_s1 + $0x168] sm:$0xff] }
 0x33e   : > { %3338 = vmatprep.subr.bf16.mxu1 %v3630_v3  ;;  %v3375_v33 = vpack.c.bf16 %v2407_v32, %v2406_v31 }
 0x341   : > { %3340 = vmatpush3.bf16.msra.mxu1 %v3339_v35  ;;  %v2409_v35 = vld [vmem:[%s4562_s1 + $0x178] sm:$0xff] }
 0x342   : > { %3341 = vmatprep.subr.bf16.mxu1 %v3630_v3  ;;  %v3378_v36 = vpack.c.bf16 %v2409_v35, %v2408_v34 }
 0x345   : > { %3343 = vmatpush3.bf16.msra.mxu1 %v3342_v38 }
 0x346   : > { %3344 = vmatprep.subr.bf16.mxu1 %v3630_v3 }
 0x349   : > { %3346 = vmatpush3.bf16.msra.mxu1 %v3345_v41  ;;  %v2411_v41 = vld [vmem:[%s4562_s1 + $0x308] sm:$0xff] }
 0x34a   : > { %3347 = vmatprep.subr.bf16.mxu1 %v3630_v3  ;;  %v3381_v42 = vpack.c.bf16 %v2411_v41, %v2410_v40 }
 0x34d   : > { %3349 = vmatpush3.bf16.msra.mxu1 %v3348_v44  ;;  %v2413_v44 = vld [vmem:[%s4562_s1 + $0x318] sm:$0xff] }
 0x34e   : > { %3350 = vmatprep.subr.bf16.mxu1 %v3630_v3  ;;  %v3384_v45 = vpack.c.bf16 %v2413_v44, %v2412_v43  ;;  %v2463_v44 = vld [vmem:[%s4562_s1 + $0x380] sm:$0xff] }
 0x351   : > { %3352 = vmatpush3.bf16.msra.mxu1 %v3351_v47  ;;  %v2415_v47 = vld [vmem:[%s4562_s1 + $0x328] sm:$0xff] }
 0x352   : > { %3353 = vmatprep.subr.bf16.mxu1 %v3630_v3  ;;  %v3387_v48 = vpack.c.bf16 %v2415_v47, %v2414_v46 }
 0x355   : > { %3355 = vmatpush3.bf16.msra.mxu1 %v3354_v51  ;;  %v2417_v51 = vld [vmem:[%s4562_s1 + $0x338] sm:$0xff] }
 0x356   : > { %2952 = vmatprep.subr.mxu1 %v3632_v11 }
 0x358   : > { %2950 = vmatmul.mubr.f32.vlgmr.msra.gmra.mrb[8].mxu1 %v3835_v50 }
 0x359   : > { %2954 = vmatprep.mubr.msk.f32.mxu1 %vm3631_vm0, %v3632_v11 }
 0x35e   : > { %2953 = vmatpush3.xpose.msk.msra.mxu1 %vm483_vm1, %v816_v52  ;;  %v3390_v52 = vpack.c.bf16 %v2417_v51, %v2416_v49  ;;  %v2442_v51 = vld [vmem:[%s4563_s2 + $0x10] sm:$0xff] }
 0x35f   : > { %2957 = vmatprep.subr.mxu1 %v3632_v11 }
 0x3eb   : > { %v4101_v54 = vpop.f32.mrb[4].mxu1 }
 0x3ec   : > { %v2846_v55 = vpop.f32.mrb[5].mxu1 }
 0x40b   : > { %v729_v56 = vpop.f32.mrb[6].mxu1 }
 0x40c   : > { %v2881_v57 = vpop.f32.mrb[7].mxu1  ;;  %2955 = vmatmul.mubr.msk.f32.vlgmr.msra.gmra.mrb[10].mxu1 %vm483_vm1, %v729_v56  ;;  %v2420_v56 = vld [vmem:[%s4562_s1 + $0x350] sm:$0xff] }
 0x40d   : > { %2959 = vmatprep.mubr.msk.f32.mxu1 %vm3631_vm0, %v3632_v11  ;;  %v2421_v57 = vld [vmem:[%s4562_s1 + $0x358] sm:$0xff] }
 0x42b   : > { %v903_v58 = vpop.f32.mrb[8].mxu1 }
 0x42c   : > { %v2951_v59 = vpop.f32.mrb[9].mxu1  ;;  %2958 = vmatpush3.msra.mxu1 %v903_v58  ;;  %v3396_v58 = vpack.c.bf16 %v2421_v57, %v2420_v56  ;;  %v2468_v56 = vld [vmem:[%s4562_s1 + $0x3a8] sm:$0xff] }
 0x42d   : > { %3356 = vmatprep.subr.bf16.mxu1 %v3630_v3  ;;  %v2422_v59 = vld [vmem:[%s4562_s1 + $0x360] sm:$0xff] }
 0x4df   : > { %v981_v60 = vpop.f32.mrb[10].mxu1 }
 0x4e0   : > { %v985_v61 = vmul.f32 0.35355338, %v981_v60  ;;  %v2956_v62 = vpop.f32.mrb[11].mxu1  ;;  %v2423_v60 = vld [vmem:[%s4562_s1 + $0x368] sm:$0xff] }
 0x4e1   : > { %v2424_v62 = vld [vmem:[%s4562_s1 + $0x370] sm:$0xff] }
 0x4e2   : > { %v986_v63 = vadd.f32 %v985_v61, %v3913_v23  ;;  %v3399_v61 = vpack.c.bf16 %v2423_v60, %v2422_v59  ;;  %v2470_v59 = vld [vmem:[%s4562_s1 + $0x3b8] sm:$0xff] }
 0x4e4   : > { %v987_v0 = vsel %vm483_vm1, %v986_v63, -inf }
 0x4e5   : > { %988 = vmax.xlane.f32.xlu1 %v987_v0 }
 0x572   : > { %v989_v1 = vpop.xlane.xlu1 %988 }
 0x573   : > { %v990_v2 = vsub.f32 %v986_v63, %v989_v1  ;;  %v2425_v63 = vld [vmem:[%s4562_s1 + $0x378] sm:$0xff] }
 0x574   : > { %v3402_v0 = vpack.c.bf16 %v2425_v63, %v2424_v62  ;;  %v2472_v62 = vld [vmem:[%s4562_s1 + $0x3c8] sm:$0xff] }
 0x575   : > { %v991_v4 = vmul.f32 1.442695, %v990_v2 }
 0x577   : > { %3553 = vpow2.f32 %v991_v4 }
 0x581   : > { %v3554_v5 = vpop.eup %3553 }
 0x582   : > { %v993_v6 = vsel %vm483_vm1, %v3554_v5, 0.0 }
 0x583   : > { %994 = vadd.xlane.f32.xlu1 %v993_v6  ;;  %v2426_v6 = vld [vmem:[%s4562_s1 + $0x500] sm:$0xff] }
 0x610   : > { %v995_v8 = vpop.xlane.xlu1 %994 }
 0x611   : > { %3555 = vrcp.f32 %v995_v8  ;;  %v2428_v8 = vld [vmem:[%s4562_s1 + $0x510] sm:$0xff] }
 0x61b   : > { %v3556_v9 = vpop.eup %3555 }
 0x61c   : > { %v997_v10 = vmul.f32 %v3556_v9, %v3554_v5  ;;  %v3405_v9 = vpack.c.bf16 %v2427_v7, %v2426_v6  ;;  %v2477_v7 = vld [vmem:[%s4562_s1 + $0x3f0] sm:$0xff] }
 0x61e   : > { %2960 = vmatmul.mubr.msk.f32.vlgmr.msra.gmra.mrb[12].mxu1 %vm483_vm1, %v997_v10  ;;  %v2429_v10 = vld [vmem:[%s4562_s1 + $0x518] sm:$0xff] }
 0x61f   : > { %3004 = vmatprep.mubr.msk.f32.mxu1 %vm3631_vm0, %v3632_v11  ;;  %3358 = vmatpush3.bf16.msra.mxu1 %v3357_v14  ;;  %v3408_v12 = vpack.c.bf16 %v2429_v10, %v2428_v8  ;;  %v2431_v14 = vld [vmem:[%s4562_s1 + $0x528] sm:$0xff]  ;;  %v2478_v8 = vld [vmem:[%s4562_s1 + $0x3f8] sm:$0xff]  ;;  %v2447_v10 = vld [vmem:[%s4562_s1 + $0x180] sm:$0xff] }
 0x620   : > { %3359 = vmatprep.subr.bf16.mxu1 %v3630_v3  ;;  %v3411_v15 = vpack.c.bf16 %v2431_v14, %v2430_v13  ;;  %v2449_v14 = vld [vmem:[%s4562_s1 + $0x190] sm:$0xff] }
 0x623   : > { %3361 = vmatpush3.bf16.msra.mxu1 %v3360_v17  ;;  %v2433_v17 = vld [vmem:[%s4562_s1 + $0x538] sm:$0xff] }
 0x624   : > { %3362 = vmatprep.subr.bf16.mxu1 %v3630_v3  ;;  %v3414_v18 = vpack.c.bf16 %v2433_v17, %v2432_v16 }
 0x627   : > { %3364 = vmatpush3.bf16.msra.mxu1 %v3363_v20  ;;  %v2435_v20 = vld [vmem:[%s4562_s1 + $0x548] sm:$0xff] }
 0x628   : > { %3365 = vmatprep.subr.bf16.mxu1 %v3630_v3  ;;  %v3417_v21 = vpack.c.bf16 %v2435_v20, %v2434_v19  ;;  %v2451_v19 = vld [vmem:[%s4562_s1 + $0x1a0] sm:$0xff]  ;;  %v2452_v20 = vld [vmem:[%s4562_s1 + $0x1a8] sm:$0xff] }
 0x62b   : > { %3367 = vmatpush3.bf16.msra.mxu1 %v3366_v24  ;;  %v2437_v24 = vld [vmem:[%s4562_s1 + $0x558] sm:$0xff] }
 0x62c   : > { %3368 = vmatprep.subr.bf16.mxu1 %v3630_v3  ;;  %v3420_v25 = vpack.c.bf16 %v2437_v24, %v2436_v22  ;;  %v2453_v22 = vld [vmem:[%s4562_s1 + $0x1b0] sm:$0xff]  ;;  %v2454_v24 = vld [vmem:[%s4562_s1 + $0x1b8] sm:$0xff] }
 0x62f   : > { %3370 = vmatpush3.bf16.msra.mxu1 %v3369_v27  ;;  %v2439_v27 = vld [vmem:[%s4562_s1 + $0x568] sm:$0xff] }
 0x630   : > { %3371 = vmatprep.subr.bf16.mxu1 %v3630_v3  ;;  %v3423_v28 = vpack.c.bf16 %v2439_v27, %v2438_v26  ;;  %v2455_v26 = vld [vmem:[%s4562_s1 + $0x1c0] sm:$0xff]  ;;  %v2456_v27 = vld [vmem:[%s4562_s1 + $0x1c8] sm:$0xff] }
 0x633   : > { %3373 = vmatpush3.bf16.msra.mxu1 %v3372_v30  ;;  %v2441_v30 = vld [vmem:[%s4562_s1 + $0x578] sm:$0xff] }
 0x634   : > { %3374 = vmatprep.subr.bf16.mxu1 %v3630_v3  ;;  %v3426_v31 = vpack.c.bf16 %v2441_v30, %v2440_v29  ;;  %v2457_v29 = vld [vmem:[%s4562_s1 + $0x1d0] sm:$0xff]  ;;  %v2458_v30 = vld [vmem:[%s4562_s1 + $0x1d8] sm:$0xff] }
 0x637   : > { %3376 = vmatpush3.bf16.msra.mxu1 %v3375_v33 }
 0x638   : > { %3377 = vmatprep.subr.bf16.mxu1 %v3630_v3 }
 0x63b   : > { %3379 = vmatpush3.bf16.msra.mxu1 %v3378_v36 }
 0x63c   : > { %3404 = vmatprep.subr.bf16.mxu1 %v3630_v3 }
 0x63e   : > { %3005 = vmatmul.mubr.f32.vlgmr.msra.gmra.mrb[14].mxu1 %v3835_v50 }
 0x63f   : > { %3074 = vmatprep.mubr.msk.f32.mxu1 %vm3631_vm0, %v3632_v11  ;;  %3406 = vmatpush3.bf16.msra.mxu1 %v3405_v9  ;;  %v3474_v9 = vpack.c.bf16 %v2478_v8, %v2477_v7 }
 0x640   : > { %3407 = vmatprep.subr.bf16.mxu1 %v3630_v3 }
 0x643   : > { %3409 = vmatpush3.bf16.msra.mxu1 %v3408_v12  ;;  %v2448_v12 = vld [vmem:[%s4562_s1 + $0x188] sm:$0xff] }
 0x644   : > { %3410 = vmatprep.subr.bf16.mxu1 %v3630_v3  ;;  %v3429_v13 = vpack.c.bf16 %v2448_v12, %v2447_v10 }
 0x647   : > { %3412 = vmatpush3.bf16.msra.mxu1 %v3411_v15  ;;  %v2450_v15 = vld [vmem:[%s4562_s1 + $0x198] sm:$0xff] }
 0x648   : > { %3413 = vmatprep.subr.bf16.mxu1 %v3630_v3 }
 0x64b   : > { %3415 = vmatpush3.bf16.msra.mxu1 %v3414_v18  ;;  %v3432_v18 = vpack.c.bf16 %v2450_v15, %v2449_v14 }
 0x64c   : > { %3416 = vmatprep.subr.bf16.mxu1 %v3630_v3 }
 0x64f   : > { %3418 = vmatpush3.bf16.msra.mxu1 %v3417_v21  ;;  %v3435_v21 = vpack.c.bf16 %v2452_v20, %v2451_v19 }
 0x650   : > { %3419 = vmatprep.subr.bf16.mxu1 %v3630_v3 }
 0x653   : > { %3421 = vmatpush3.bf16.msra.mxu1 %v3420_v25  ;;  %v3438_v25 = vpack.c.bf16 %v2454_v24, %v2453_v22 }
 0x654   : > { %3422 = vmatprep.subr.bf16.mxu1 %v3630_v3 }
 0x657   : > { %3424 = vmatpush3.bf16.msra.mxu1 %v3423_v28  ;;  %v3441_v28 = vpack.c.bf16 %v2456_v27, %v2455_v26 }
 0x658   : > { %3425 = vmatprep.subr.bf16.mxu1 %v3630_v3 }
 0x65b   : > { %3427 = vmatpush3.bf16.msra.mxu1 %v3426_v31  ;;  %v3444_v31 = vpack.c.bf16 %v2458_v30, %v2457_v29 }
 0x65c   : > { %3452 = vmatprep.subr.bf16.mxu1 %v3630_v3 }
 0x65e   : > { %3075 = vmatmul.mubr.f32.vlgmr.msra.gmra.mrb[16].mxu1 %v3835_v50 }
 0x65f   : > { %3159 = vmatprep.mubr.msk.f32.mxu1 %vm3631_vm0, %v3632_v11 }
 0x6f1   : > { %v1067_v38 = vpop.f32.mrb[12].mxu1 }
 0x6f2   : > { %v2961_v39 = vpop.f32.mrb[13].mxu1  ;;  %2965 = vmatmul.mubr.msk.f32.vlgmr.msra.gmra.mrb[6].mxu0 %vm483_vm1, %v1067_v38 }
 0x6f3   : > { %2968 = vmatpush3.msra.mxu0 %v482_v37  ;;  %2969 = vmatprep.mubr.msk.f32.mxu0 %vm3631_vm0, %v3632_v11 }
 0x6f4   : > { %3380 = vmatprep.subr.bf16.mxu0 %v3630_v3 }
 0x6fa   : > { %2970 = vmatmul.mubr.msk.f32.vlgmr.msra.gmra.mrb[6].mxu0 %vm483_vm1, %v4101_v54  ;;  %v2419_v54 = vld [vmem:[%s4562_s1 + $0x348] sm:$0xff] }
 0x6fb   : > { %3382 = vmatpush3.bf16.msra.mxu0 %v3381_v42  ;;  %3039 = vmatprep.mubr.msk.f32.mxu0 %vm3631_vm0, %v3632_v11  ;;  %v3393_v55 = vpack.c.bf16 %v2419_v54, %v2418_v53  ;;  %v2466_v53 = vld [vmem:[%s4562_s1 + $0x398] sm:$0xff] }
 0x6fc   : > { %3383 = vmatprep.subr.bf16.mxu0 %v3630_v3 }
 0x6ff   : > { %3385 = vmatpush3.bf16.msra.mxu0 %v3384_v45  ;;  %v2464_v45 = vld [vmem:[%s4562_s1 + $0x388] sm:$0xff] }
 0x700   : > { %3386 = vmatprep.subr.bf16.mxu0 %v3630_v3  ;;  %v3453_v46 = vpack.c.bf16 %v2464_v45, %v2463_v44  ;;  %v2482_v45 = vld [vmem:[%s4562_s1 + $0x598] sm:$0xff] }
 0x702   : > { %3454 = vmatpush3.bf16.msra.mxu1 %v3453_v46 }
 0x703   : > { %3388 = vmatpush3.bf16.msra.mxu0 %v3387_v48  ;;  %3455 = vmatprep.subr.bf16.mxu1 %v3630_v3 }
 0x704   : > { %3389 = vmatprep.subr.bf16.mxu0 %v3630_v3 }
 0x707   : > { %3391 = vmatpush3.bf16.msra.mxu0 %v3390_v52  ;;  %v2465_v52 = vld [vmem:[%s4562_s1 + $0x390] sm:$0xff] }
 0x708   : > { %3392 = vmatprep.subr.bf16.mxu0 %v3630_v3  ;;  %v3456_v54 = vpack.c.bf16 %v2466_v53, %v2465_v52  ;;  %v2486_v52 = vld [vmem:[%s4562_s1 + $0x5b8] sm:$0xff] }
 0x70a   : > { %3457 = vmatpush3.bf16.msra.mxu1 %v3456_v54  ;;  %v2487_v54 = vld [vmem:[%s4562_s1 + $0x5c0] sm:$0xff] }
 0x70b   : > { %3394 = vmatpush3.bf16.msra.mxu0 %v3393_v55  ;;  %3458 = vmatprep.subr.bf16.mxu1 %v3630_v3  ;;  %v2467_v55 = vld [vmem:[%s4562_s1 + $0x3a0] sm:$0xff] }
 0x70c   : > { %3395 = vmatprep.subr.bf16.mxu0 %v3630_v3  ;;  %v3459_v57 = vpack.c.bf16 %v2468_v56, %v2467_v55  ;;  %v2488_v55 = vld [vmem:[%s4562_s1 + $0x5c8] sm:$0xff] }
 0x70d   : > { %v3489_v56 = vpack.c.bf16 %v2488_v55, %v2487_v54 }
 0x70e   : > { %3460 = vmatpush3.bf16.msra.mxu1 %v3459_v57  ;;  %v2489_v57 = vld [vmem:[%s4562_s1 + $0x5d0] sm:$0xff] }
 0x70f   : > { %3397 = vmatpush3.bf16.msra.mxu0 %v3396_v58  ;;  %v2469_v58 = vld [vmem:[%s4562_s1 + $0x3b0] sm:$0xff]  ;;  %3461 = vmatprep.subr.bf16.mxu1 %v3630_v3 }
 0x710   : > { %3398 = vmatprep.subr.bf16.mxu0 %v3630_v3  ;;  %v3462_v60 = vpack.c.bf16 %v2470_v59, %v2469_v58  ;;  %v2490_v58 = vld [vmem:[%s4562_s1 + $0x5d8] sm:$0xff] }
 0x711   : > { %v1300_v1 = vpop.f32.mrb[14].mxu1  ;;  %v3492_v59 = vpack.c.bf16 %v2490_v58, %v2489_v57 }
 0x712   : > { %v3006_v2 = vpop.f32.mrb[15].mxu1  ;;  %3463 = vmatpush3.bf16.msra.mxu1 %v3462_v60  ;;  %v2491_v60 = vld [vmem:[%s4562_s1 + $0x5e0] sm:$0xff] }
 0x713   : > { %3400 = vmatpush3.bf16.msra.mxu0 %v3399_v61  ;;  %v2471_v61 = vld [vmem:[%s4562_s1 + $0x3c0] sm:$0xff]  ;;  %3464 = vmatprep.subr.bf16.mxu1 %v3630_v3 }
 0x714   : > { %3401 = vmatprep.subr.bf16.mxu0 %v3630_v3  ;;  %v3465_v63 = vpack.c.bf16 %v2472_v62, %v2471_v61  ;;  %v2492_v61 = vld [vmem:[%s4562_s1 + $0x5e8] sm:$0xff] }
 0x715   : > { %v3495_v62 = vpack.c.bf16 %v2492_v61, %v2491_v60 }
 0x716   : > { %3466 = vmatpush3.bf16.msra.mxu1 %v3465_v63  ;;  %v2493_v63 = vld [vmem:[%s4562_s1 + $0x5f0] sm:$0xff] }
 0x717   : > { %3403 = vmatpush3.bf16.msra.mxu0 %v3402_v0  ;;  %v2473_v0 = vld [vmem:[%s4562_s1 + $0x3d0] sm:$0xff]  ;;  %3467 = vmatprep.subr.bf16.mxu1 %v3630_v3 }
 0x718   : > { %3077 = vmatprep.subr.mxu0 %v3632_v11 }
 0x71a   : > { %3040 = vmatmul.mubr.f32.vlgmr.msra.gmra.mrb[8].mxu0 %v3835_v50 }
 0x71b   : > { %3079 = vmatprep.mubr.msk.f32.mxu0 %vm3631_vm0, %v3632_v11 }
 0x731   : > { %v1474_v42 = vpop.f32.mrb[16].mxu1 }
 0x732   : > { %v3076_v43 = vpop.f32.mrb[17].mxu1 }
 0x733   : > { %v2481_v43 = vld [vmem:[%s4562_s1 + $0x590] sm:$0xff] }
 0x734   : > { %v3480_v46 = vpack.c.bf16 %v2482_v45, %v2481_v43 }
 0x7ed   : > { %v1387_v4 = vpop.f32.mrb[8].mxu0 }
 0x7ee   : > { %v3041_v5 = vpop.f32.mrb[9].mxu0  ;;  %3078 = vmatpush3.xpose.msk.msra.mxu0 %vm483_vm1, %v1387_v4  ;;  %v2475_v4 = vld [vmem:[%s4562_s1 + $0x3e0] sm:$0xff] }
 0x7ef   : > { %3082 = vmatprep.subr.mxu0 %v3632_v11  ;;  %v2476_v5 = vld [vmem:[%s4562_s1 + $0x3e8] sm:$0xff] }
 0x7f0   : > { %v3471_v6 = vpack.c.bf16 %v2476_v5, %v2475_v4 }
 0x7f1   : > { %3080 = vmatmul.mubr.msk.f32.vlgmr.msra.gmra.mrb[10].mxu0 %vm483_vm1, %v1300_v1  ;;  %v2474_v1 = vld [vmem:[%s4562_s1 + $0x3d8] sm:$0xff] }
 0x7f2   : > { %3084 = vmatprep.mubr.msk.f32.mxu0 %vm3631_vm0, %v3632_v11  ;;  %3083 = vmatpush3.msra.mxu0 %v1474_v42  ;;  %v3468_v2 = vpack.c.bf16 %v2474_v1, %v2473_v0  ;;  %v2480_v42 = vld [vmem:[%s4562_s1 + $0x588] sm:$0xff]  ;;  %v2494_v0 = vld [vmem:[%s4562_s1 + $0x5f8] sm:$0xff] }
 0x7f3   : > { %3087 = vmatprep.subr.mxu0 %v3632_v11  ;;  %v3498_v1 = vpack.c.bf16 %v2494_v0, %v2493_v63 }
 0x7f4   : > { %3469 = vmatpush3.bf16.msra.mxu1 %v3468_v2  ;;  %v3565_v2 = vld [vmem:[%s3831_s27] sm:$0xff] }
 0x7f5   : > { %3470 = vmatprep.subr.bf16.mxu1 %v3630_v3 }
 0x7f8   : > { %3472 = vmatpush3.bf16.msra.mxu1 %v3471_v6 }
 0x7f9   : > { %3473 = vmatprep.subr.bf16.mxu1 %v3630_v3 }
 0x7fc   : > { %3475 = vmatpush3.bf16.msra.mxu1 %v3474_v9 }
 0x7fd   : > { %3197 = vmatprep.subr.mxu1 %v3632_v11 }
 0x7ff   : > { %3160 = vmatmul.mubr.f32.vlgmr.msra.gmra.mrb[18].mxu1 %v3835_v50 }
 0x800   : > { %3199 = vmatprep.mubr.msk.f32.mxu1 %vm3631_vm0, %v3632_v11 }
 0x8c4   : > { %v1552_v32 = vpop.f32.mrb[10].mxu0 }
 0x8c5   : > { %v1556_v33 = vmul.f32 0.35355338, %v1552_v32  ;;  %v3081_v34 = vpop.f32.mrb[11].mxu0  ;;  %v2459_v32 = vld [vmem:[%s4562_s1 + $0x1e0] sm:$0xff] }
 0x8c7   : > { %v1557_v35 = vadd.f32 %v1556_v33, %v3913_v23  ;;  %v2460_v33 = vld [vmem:[%s4562_s1 + $0x1e8] sm:$0xff] }
 0x8c8   : > { %v3447_v34 = vpack.c.bf16 %v2460_v33, %v2459_v32 }
 0x8c9   : > { %v1558_v36 = vsel %vm483_vm1, %v1557_v35, -inf }
 0x8ca   : > { %1559 = vmax.xlane.f32.xlu0 %v1558_v36  ;;  %v2462_v36 = vld [vmem:[%s4562_s1 + $0x1f8] sm:$0xff] }
 0x957   : > { %v1560_v37 = vpop.xlane.xlu0 %1559 }
 0x958   : > { %v1561_v38 = vsub.f32 %v1557_v35, %v1560_v37  ;;  %v2461_v35 = vld [vmem:[%s4562_s1 + $0x1f0] sm:$0xff] }
 0x959   : > { %v3450_v37 = vpack.c.bf16 %v2462_v36, %v2461_v35 }
 0x95a   : > { %v1562_v39 = vmul.f32 1.442695, %v1561_v38  ;;  %v1886_v38 = vpop.f32.mrb[18].mxu1 }
 0x95b   : > { %3198 = vmatpush3.xpose.msk.msra.mxu1 %vm483_vm1, %v1886_v38 }
 0x95c   : > { %3557 = vpow2.f32 %v1562_v39  ;;  %v3161_v39 = vpop.f32.mrb[19].mxu1  ;;  %3202 = vmatprep.subr.mxu1 %v3632_v11 }
 0x966   : > { %v3558_v40 = vpop.eup %3557 }
 0x967   : > { %v1564_v41 = vsel %vm483_vm1, %v3558_v40, 0.0 }
 0x968   : > { %1565 = vadd.xlane.f32.xlu1 %v1564_v41 }
 0x9f5   : > { %v1566_v47 = vpop.xlane.xlu1 %1565 }
 0x9f6   : > { %3559 = vrcp.f32 %v1566_v47  ;;  %v2483_v47 = vld [vmem:[%s4562_s1 + $0x5a0] sm:$0xff] }
 0xa00   : > { %v3560_v48 = vpop.eup %3559 }
 0xa01   : > { %v1568_v49 = vmul.f32 %v3560_v48, %v3558_v40  ;;  %v2484_v48 = vld [vmem:[%s4562_s1 + $0x5a8] sm:$0xff] }
 0xa03   : > { %3085 = vmatmul.mubr.msk.f32.vlgmr.msra.gmra.mrb[12].mxu0 %vm483_vm1, %v1568_v49  ;;  %v3483_v49 = vpack.c.bf16 %v2484_v48, %v2483_v47 }
 0xa04   : > { %3088 = vmatpush3.msra.mxu0 %v2442_v51  ;;  %3089 = vmatprep.mubr.msk.f32.mxu0 %vm3631_vm0, %v3632_v11  ;;  %v2485_v51 = vld [vmem:[%s4562_s1 + $0x5b0] sm:$0xff] }
 0xa05   : > { %3428 = vmatprep.subr.bf16.mxu0 %v3630_v3  ;;  %v3486_v53 = vpack.c.bf16 %v2486_v52, %v2485_v51 }
 0xad6   : > { %v1638_v16 = vpop.f32.mrb[12].mxu0 }
 0xad7   : > { %v3086_v17 = vpop.f32.mrb[13].mxu0  ;;  %3090 = vmatmul.mubr.msk.f32.vlgmr.msra.gmra.mrb[6].mxu0 %vm483_vm1, %v1638_v16 }
 0xad8   : > { %3430 = vmatpush3.bf16.msra.mxu0 %v3429_v13  ;;  %3124 = vmatprep.mubr.msk.f32.mxu0 %vm3631_vm0, %v3632_v11 }
 0xad9   : > { %3431 = vmatprep.subr.bf16.mxu0 %v3630_v3 }
 0xadc   : > { %3433 = vmatpush3.bf16.msra.mxu0 %v3432_v18 }
 0xadd   : > { %3434 = vmatprep.subr.bf16.mxu0 %v3630_v3 }
 0xae0   : > { %3436 = vmatpush3.bf16.msra.mxu0 %v3435_v21 }
 0xae1   : > { %3437 = vmatprep.subr.bf16.mxu0 %v3630_v3 }
 0xae4   : > { %3439 = vmatpush3.bf16.msra.mxu0 %v3438_v25 }
 0xae5   : > { %3440 = vmatprep.subr.bf16.mxu0 %v3630_v3 }
 0xae8   : > { %3442 = vmatpush3.bf16.msra.mxu0 %v3441_v28 }
 0xae9   : > { %3443 = vmatprep.subr.bf16.mxu0 %v3630_v3 }
 0xaec   : > { %3445 = vmatpush3.bf16.msra.mxu0 %v3444_v31 }
 0xaed   : > { %3446 = vmatprep.subr.bf16.mxu0 %v3630_v3 }
 0xaf0   : > { %3448 = vmatpush3.bf16.msra.mxu0 %v3447_v34 }
 0xaf1   : > { %3449 = vmatprep.subr.bf16.mxu0 %v3630_v3 }
 0xaf4   : > { %3451 = vmatpush3.bf16.msra.mxu0 %v3450_v37 }
 0xaf5   : > { %3476 = vmatprep.subr.bf16.mxu0 %v3630_v3 }
 0xaf7   : > { %3125 = vmatmul.mubr.f32.vlgmr.msra.gmra.mrb[14].mxu0 %v3835_v50  ;;  %v2479_v50 = vld [vmem:[%s4562_s1 + $0x580] sm:$0xff] }
 0xaf8   : > { %3194 = vmatprep.mubr.msk.f32.mxu0 %vm3631_vm0, %v3632_v11  ;;  %v3477_v44 = vpack.c.bf16 %v2480_v42, %v2479_v50 }
 0xafa   : > { %3478 = vmatpush3.bf16.msra.mxu0 %v3477_v44 }
 0xafb   : > { %3479 = vmatprep.subr.bf16.mxu0 %v3630_v3 }
 0xafe   : > { %3481 = vmatpush3.bf16.msra.mxu0 %v3480_v46 }
 0xaff   : > { %3482 = vmatprep.subr.bf16.mxu0 %v3630_v3 }
 0xb02   : > { %3484 = vmatpush3.bf16.msra.mxu0 %v3483_v49 }
 0xb03   : > { %3485 = vmatprep.subr.bf16.mxu0 %v3630_v3 }
 0xb06   : > { %3487 = vmatpush3.bf16.msra.mxu0 %v3486_v53 }
 0xb07   : > { %3488 = vmatprep.subr.bf16.mxu0 %v3630_v3 }
 0xb0a   : > { %3490 = vmatpush3.bf16.msra.mxu0 %v3489_v56 }
 0xb0b   : > { %3491 = vmatprep.subr.bf16.mxu0 %v3630_v3 }
 0xb0e   : > { %3493 = vmatpush3.bf16.msra.mxu0 %v3492_v59 }
 0xb0f   : > { %3494 = vmatprep.subr.bf16.mxu0 %v3630_v3 }
 0xb12   : > { %3496 = vmatpush3.bf16.msra.mxu0 %v3495_v62 }
 0xb13   : > { %3497 = vmatprep.subr.bf16.mxu0 %v3630_v3 }
 0xb16   : > { %3499 = vmatpush3.bf16.msra.mxu0 %v3498_v1 }
 0xb17   : > { %3207 = vmatprep.subr.mxu0 %v3632_v11 }
 0xb19   : > { %3195 = vmatmul.mubr.f32.vlgmr.msra.gmra.mrb[16].mxu0 %v3565_v2 }
 0xb1a   : > { %3209 = vmatprep.mubr.msk.f32.mxu0 %vm3631_vm0, %v3632_v11 }
 0xbca   : > { %v1799_v40 = vpop.f32.mrb[14].mxu0 }
 0xbcb   : > { %v3126_v41 = vpop.f32.mrb[15].mxu0  ;;  %3200 = vmatmul.mubr.msk.f32.vlgmr.msra.gmra.mrb[20].mxu1 %vm483_vm1, %v1799_v40 }
 0xbcc   : > { %3204 = vmatprep.mubr.msk.f32.mxu1 %vm3631_vm0, %v3632_v11  ;;  %v2495_v11 = vld [vmem:[%s4563_s2 + $0x18] sm:$0xff] }
 0xbcd   : > { %3208 = vmatpush3.msra.mxu0 %v2495_v11 }
 0xbec   : > { %v1973_v14 = vpop.f32.mrb[16].mxu0 }
 0xbed   : > { %v3196_v15 = vpop.f32.mrb[17].mxu0  ;;  %3203 = vmatpush3.msra.mxu1 %v1973_v14 }
 0xc9e   : > { %v2051_v4 = vpop.f32.mrb[20].mxu1 }
 0xc9f   : > { %v2055_v5 = vmul.f32 0.35355338, %v2051_v4  ;;  %v3201_v6 = vpop.f32.mrb[21].mxu1 }
 0xca1   : > { %v2056_v7 = vadd.f32 %v2055_v5, %v3913_v23 }
 0xca3   : > { %v2057_v8 = vsel %vm483_vm1, %v2056_v7, -inf }
 0xca4   : > { %2058 = vmax.xlane.f32.xlu0 %v2057_v8 }
 0xd31   : > { %v2059_v9 = vpop.xlane.xlu0 %2058 }
 0xd32   : > { %v2060_v10 = vsub.f32 %v2056_v7, %v2059_v9 }
 0xd34   : > { %v2061_v12 = vmul.f32 1.442695, %v2060_v10 }
 0xd36   : > { %3561 = vpow2.f32 %v2061_v12 }
 0xd40   : > { %v3562_v3 = vpop.eup %3561 }
 0xd41   : > { %v2063_v13 = vsel %vm483_vm1, %v3562_v3, 0.0 }
 0xd42   : > { %2064 = vadd.xlane.f32.xlu1 %v2063_v13 }
 0xdcf   : > { %v2065_v23 = vpop.xlane.xlu1 %2064 }
 0xdd0   : > { %3563 = vrcp.f32 %v2065_v23 }
 0xdda   : > { %v3564_v16 = vpop.eup %3563 }
 0xddb   : > { %v2067_v17 = vmul.f32 %v3564_v16, %v3562_v3 }
 0xddd   : > { %3205 = vmatmul.mubr.msk.f32.vlgmr.msra.gmra.mrb[22].mxu1 %vm483_vm1, %v2067_v17 }
 0xeb0   : > { %v2137_v18 = vpop.f32.mrb[22].mxu1 }
 0xeb1   : > { %v3206_v19 = vpop.f32.mrb[23].mxu1  ;;  %3210 = vmatmul.mubr.msk.f32.vlgmr.msra.gmra.mrb[6].mxu0 %vm483_vm1, %v2137_v18 }
 0xf84   : > { %v2210_v20 = vpop.f32.mrb[6].mxu0 }
 0xf85   : > { %2215 = vst [vmem:[%s199_s22] sm:$0xff] %v2210_v20  ;;  %v3211_v21 = vpop.f32.mrb[7].mxu0 }
 0xf86   : > { %3579 = shalt.err (!%p3576_p3)
}
 0xf87   : > { %s3580_s10 = scalar_lea.hbm %s4521_s5, 128  ;;  %s3584_s27 = scalar_lea.hbm %s4565_s4, 256 }
 0xf88   : > { %p3581_p4 = scmp.ne.s32.totalorder %s4521_s5, %s3580_s10  ;;  %p3585_p9 = scmp.lt.u32.totalorder %s4521_s5, %s4565_s4 }
 0xf89   : > { %p3586_p10 = scmp.lt.u32.totalorder %s3584_s27, %s3580_s10  ;;  %p3588_p12 = scmp.lt.u32.totalorder %s3580_s10, %s4521_s5 }
 0xf8a   : > { %p3582_p7 = pnand %p3581_p4, %p3698_p5 }
 0xf8b   : > { %p3587_p11 = por %p3586_p10, %p3585_p9 }
 0xf8c   : > { %p3583_p8 = pneg %p3582_p7 }
 0xf8d   : > { %p3589_p13 = por %p3588_p12, %p3587_p11 }
 0xf8f   : > { %p3590_p0 = pnand %p3589_p13, %p3583_p8 }
 0xf91   : > { %3593 = shalt.err (!%p3590_p0)
}
 0xf92   : > { %3506 = dma.vmem_to_hbm [thread:$0]  (%p3698_p5), %s4516_s23, 128, %s4521_s5, %s2217_s7  }
 0xf93 PF: > { %p3512_p1 = scmp.ge.s32.totalorder %s3628_s18, 2  ;;  %s2242_s20 = sand.u32 1, %s3616_s15  }
 0xf94   : > { %s2243_s22 = scalar_lea.sflag [#allocation3], %s2242_s20 }
 0xf95   : > { %p3509_p2 = pnand %p3512_p1, %p3702_p6 }
 0xf97   : > { %3611 = dma.done.wait (!%p3509_p2), %s2243_s22, 128  }
 0xf98   : > { %3613 = vsyncadd (!%p3509_p2), %s2243_s22, 4294967168  ;;  %p14_p3 = scmp.ge.s32.totalorder %s3685_s21, 4   ;;  %s4568_s15 = smov %s3620_s16 }
 0xf99   : > { %s4569_s16 = smov %s3624_s17  ;;  %s4570_s17 = smov %s3696_s24 }
 0xf9a   : > { %s4571_s18 = smov %s3685_s21  ;;  %16 = sbr.rel (!%p14_p3) target bundleno = 3 (0x3), region = 88 }
 0xfa1   :  { %2248 = vsyncpa [#allocation3], 1 }
 0xfa2   :  { %2250 = vsyncpa [#allocation3 + $0x1], 1 }

</bundles_post_ra>
